<compile_context>
chip_gen: v6e
topology: v6e:2x2x1
jax: 0.10.0
libtpu: 0.0.40
codegen_flags: <defaults>
</compile_context>

<pallas_src>
import functools

import jax
import jax.numpy as jnp
from jax import lax
from jax.experimental import pallas as pl
from jax.experimental.pallas import tpu as pltpu

LANE = 128


def birnn_kernel(emb_ref,       # (S, E_pad)      f32
                 wih_f_ref,     # (E_pad, H_pad)  forward input->hidden (pre-transposed)
                 whh_f_ref,     # (H_pad, H_pad)  forward hidden->hidden (pre-transposed)
                 b_f_ref,       # (1, H_pad)      forward bias (b_ih + b_hh)
                 wih_b_ref,     # (E_pad, H_pad)  reverse direction
                 whh_b_ref,     # (H_pad, H_pad)
                 b_b_ref,       # (1, H_pad)
                 wtag_f_ref,    # (H_pad, T_pad)  hidden2tag weight, fwd half
                 wtag_b_ref,    # (H_pad, T_pad)  hidden2tag weight, bwd half
                 btag_ref,      # (1, T_pad)      hidden2tag bias
                 out_ref,       # (S, T_pad)      log_softmax(tag_space)
                 *, num_tags):
    S = emb_ref.shape[0]
    H = whh_f_ref.shape[0]

    emb = emb_ref[...]

    # ---- hoisted input projections (one batched matmul per direction) ----
    xw_f = jnp.dot(emb, wih_f_ref[...],
                   preferred_element_type=jnp.float32) + b_f_ref[...]     # (S, H_pad)
    xw_b = jnp.dot(emb, wih_b_ref[...],
                   preferred_element_type=jnp.float32) + b_b_ref[...]     # (S, H_pad)

    whh_f = whh_f_ref[...]
    whh_b = whh_b_ref[...]

    # ---- fused, fully-unrolled forward + backward recurrence ----
    h_f = jnp.zeros((1, H), jnp.float32)
    h_b = jnp.zeros((1, H), jnp.float32)
    fwd_rows = [None] * S
    bwd_rows = [None] * S
    for i in range(S):
        tb = S - 1 - i
        h_f = jnp.tanh(xw_f[i:i + 1, :]
                       + jnp.dot(h_f, whh_f, preferred_element_type=jnp.float32))
        h_b = jnp.tanh(xw_b[tb:tb + 1, :]
                       + jnp.dot(h_b, whh_b, preferred_element_type=jnp.float32))
        fwd_rows[i] = h_f
        bwd_rows[tb] = h_b

    fwd_hs = jnp.concatenate(fwd_rows, axis=0)   # (S, H_pad) sublane concat
    bwd_hs = jnp.concatenate(bwd_rows, axis=0)   # (S, H_pad)

    # ---- split hidden2tag matmul (no lane-axis concat), then log_softmax ----
    tag = (jnp.dot(fwd_hs, wtag_f_ref[...], preferred_element_type=jnp.float32)
           + jnp.dot(bwd_hs, wtag_b_ref[...], preferred_element_type=jnp.float32)
           + btag_ref[...])                                               # (S, T_pad)

    col = lax.broadcasted_iota(jnp.int32, tag.shape, 1)
    valid = col < num_tags
    tag = jnp.where(valid, tag, jnp.float32(-1e30))
    m = jnp.max(tag, axis=-1, keepdims=True)
    z = tag - m
    lse = jnp.log(jnp.sum(jnp.where(valid, jnp.exp(z), 0.0), axis=-1, keepdims=True))
    out_ref[...] = z - lse


def _pad2(x, rows, cols):
    return jnp.pad(x, ((0, rows - x.shape[0]), (0, cols - x.shape[1])))


def bidirectional_rnn_forward(sentence, params):
    """sentence: (S,) int32 token ids. Returns (S, tagset_size) log-probs."""
    embeds = jnp.take(params["embedding"], sentence, axis=0).astype(jnp.float32)  # (S, E)
    S, E = embeds.shape
    H = params["whh_f"].shape[0]
    T = params["wtag"].shape[1]

    pad_to = lambda n: max(LANE, ((n + LANE - 1) // LANE) * LANE)
    E_pad, H_pad, T_pad = pad_to(E), pad_to(H), pad_to(T)

    # Lane-dense, zero-padded operands (pure wrapper plumbing).
    emb_p  = _pad2(embeds, S, E_pad)
    wih_f  = _pad2(params["wih_f"], E_pad, H_pad)
    whh_f  = _pad2(params["whh_f"], H_pad, H_pad)
    b_f    = _pad2(params["b_f"], 1, H_pad)
    wih_b  = _pad2(params["wih_b"], E_pad, H_pad)
    whh_b  = _pad2(params["whh_b"], H_pad, H_pad)
    b_b    = _pad2(params["b_b"], 1, H_pad)
    wtag_f = _pad2(params["wtag"][:H], H_pad, T_pad)
    wtag_b = _pad2(params["wtag"][H:], H_pad, T_pad)
    btag   = _pad2(params["btag"], 1, T_pad)

    kernel = functools.partial(birnn_kernel, num_tags=T)

    flops = (2 * 2 * S * E_pad * H_pad          # input projections
             + 2 * 2 * S * H_pad * H_pad        # recurrences
             + 2 * 2 * S * H_pad * T_pad)       # hidden2tag
    transcendentals = 2 * S * H_pad + S * T_pad  # tanh + exp
    bytes_accessed = 4 * (S * E_pad
                          + 2 * (E_pad * H_pad + H_pad * H_pad + H_pad)
                          + 2 * H_pad * T_pad + T_pad
                          + S * T_pad)

    vmem = pl.BlockSpec(memory_space=pltpu.MemorySpace.VMEM)
    out = pl.pallas_call(
        kernel,
        out_shape=jax.ShapeDtypeStruct((S, T_pad), jnp.float32),
        in_specs=[vmem] * 10,
        out_specs=vmem,
        cost_estimate=pl.CostEstimate(flops=flops,
                                      transcendentals=transcendentals,
                                      bytes_accessed=bytes_accessed),
    )(emb_p, wih_f, whh_f, b_f, wih_b, whh_b, b_b, wtag_f, wtag_b, btag)
    return out[:, :T]


def init_params(key, vocab_size, embedding_dim, hidden_dim, tagset_size):
    """Deterministic synthetic parameters matching nn.RNN / nn.Linear init ranges."""
    ks = jax.random.split(key, 12)
    k_rnn = 1.0 / jnp.sqrt(hidden_dim)
    k_lin = 1.0 / jnp.sqrt(2 * hidden_dim)
    u = lambda k, shape, bound: jax.random.uniform(
        k, shape, jnp.float32, minval=-bound, maxval=bound)

    # PyTorch stores W_ih as (H, E), W_hh as (H, H); we pre-transpose to (E, H)/(H, H)
    # so the kernel does x @ W. Biases b_ih + b_hh are folded into a single (1, H) bias.
    params = {
        "embedding": jax.random.normal(ks[0], (vocab_size, embedding_dim), jnp.float32),
        "wih_f": u(ks[1], (embedding_dim, hidden_dim), k_rnn),
        "whh_f": u(ks[2], (hidden_dim, hidden_dim), k_rnn),
        "b_f":   (u(ks[3], (1, hidden_dim), k_rnn) + u(ks[4], (1, hidden_dim), k_rnn)),
        "wih_b": u(ks[5], (embedding_dim, hidden_dim), k_rnn),
        "whh_b": u(ks[6], (hidden_dim, hidden_dim), k_rnn),
        "b_b":   (u(ks[7], (1, hidden_dim), k_rnn) + u(ks[8], (1, hidden_dim), k_rnn)),
        "wtag":  u(ks[9], (2 * hidden_dim, tagset_size), k_lin),
        "btag":  u(ks[10], (1, tagset_size), k_lin),
    }
    return params


def reference_forward(sentence, params):
    """Pure-JAX reference mirroring the PyTorch forward semantics."""
    embeds = jnp.take(params["embedding"], sentence, axis=0)             # (S, E)
    S = embeds.shape[0]
    H = params["whh_f"].shape[0]

    def step(h, x, wih, whh, b):
        return jnp.tanh(x @ wih + h @ whh + b[0])

    h = jnp.zeros((H,), jnp.float32)
    fwd = []
    for t in range(S):
        h = step(h, embeds[t], params["wih_f"], params["whh_f"], params["b_f"])
        fwd.append(h)
    h = jnp.zeros((H,), jnp.float32)
    bwd = [None] * S
    for t in range(S - 1, -1, -1):
        h = step(h, embeds[t], params["wih_b"], params["whh_b"], params["b_b"])
        bwd[t] = h
    hs = jnp.concatenate([jnp.stack(fwd), jnp.stack(bwd)], axis=-1)      # (S, 2H)
    tag = hs @ params["wtag"] + params["btag"][0]
    return jax.nn.log_softmax(tag, axis=1)


if __name__ == "__main__":
    vocab_size, embedding_dim, hidden_dim, tagset_size = 20, 16, 32, 8
    seq_len = 8

    key = jax.random.PRNGKey(0)
    k_params, k_sent = jax.random.split(key)
    params = init_params(k_params, vocab_size, embedding_dim, hidden_dim, tagset_size)
    sentence = jax.random.randint(k_sent, (seq_len,), 0, vocab_size, dtype=jnp.int32)

    out = bidirectional_rnn_forward(sentence, params)
    out = jax.block_until_ready(out)

    ref = reference_forward(sentence, params)
    assert out.shape == (seq_len, tagset_size)
    assert jnp.allclose(out, ref, rtol=1e-4, atol=1e-4), "mismatch vs JAX reference"

    print("KERNEL_OK")
</pallas_src>

<mosaic_0001>
module attributes {stable_mosaic.version = 11 : i64} {
  func.func @birnn_kernel(%arg0: memref<8x128xf32, #tpu.memory_space<vmem>>, %arg1: memref<128x128xf32, #tpu.memory_space<vmem>>, %arg2: memref<128x128xf32, #tpu.memory_space<vmem>>, %arg3: memref<1x128xf32, #tpu.memory_space<vmem>>, %arg4: memref<128x128xf32, #tpu.memory_space<vmem>>, %arg5: memref<128x128xf32, #tpu.memory_space<vmem>>, %arg6: memref<1x128xf32, #tpu.memory_space<vmem>>, %arg7: memref<128x128xf32, #tpu.memory_space<vmem>>, %arg8: memref<128x128xf32, #tpu.memory_space<vmem>>, %arg9: memref<1x128xf32, #tpu.memory_space<vmem>>, %arg10: memref<8x128xf32, #tpu.memory_space<vmem>>) attributes {dimension_semantics = [], scalar_prefetch = 0 : i64, scratch_operands = 0 : i64, tpu.core_type = #tpu.core_type<tc>} {
    %c0 = arith.constant 0 : index
    %c0_0 = arith.constant 0 : index
    %0 = vector.load %arg0[%c0, %c0_0] : memref<8x128xf32, #tpu.memory_space<vmem>>, vector<8x128xf32>
    %c0_1 = arith.constant 0 : index
    %c0_2 = arith.constant 0 : index
    %1 = vector.load %arg1[%c0_1, %c0_2] : memref<128x128xf32, #tpu.memory_space<vmem>>, vector<128x128xf32>
    %cst = arith.constant dense<0.000000e+00> : vector<8x128xf32>
    %2 = tpu.matmul %0, %1, %cst {dimension_numbers = #tpu.dot_dimension_numbers<[1], [0], [0], [1], [0, 0, 1, 1], [], []>} : vector<8x128xf32>, vector<128x128xf32>, vector<8x128xf32> -> vector<8x128xf32>
    %c0_3 = arith.constant 0 : index
    %c0_4 = arith.constant 0 : index
    %3 = vector.load %arg3[%c0_3, %c0_4] : memref<1x128xf32, #tpu.memory_space<vmem>>, vector<1x128xf32>
    %4 = vector.broadcast %3 : vector<1x128xf32> to vector<8x128xf32>
    %5 = arith.addf %2, %4 : vector<8x128xf32>
    %c0_5 = arith.constant 0 : index
    %c0_6 = arith.constant 0 : index
    %6 = vector.load %arg4[%c0_5, %c0_6] : memref<128x128xf32, #tpu.memory_space<vmem>>, vector<128x128xf32>
    %cst_7 = arith.constant dense<0.000000e+00> : vector<8x128xf32>
    %7 = tpu.matmul %0, %6, %cst_7 {dimension_numbers = #tpu.dot_dimension_numbers<[1], [0], [0], [1], [0, 0, 1, 1], [], []>} : vector<8x128xf32>, vector<128x128xf32>, vector<8x128xf32> -> vector<8x128xf32>
    %c0_8 = arith.constant 0 : index
    %c0_9 = arith.constant 0 : index
    %8 = vector.load %arg6[%c0_8, %c0_9] : memref<1x128xf32, #tpu.memory_space<vmem>>, vector<1x128xf32>
    %9 = vector.broadcast %8 : vector<1x128xf32> to vector<8x128xf32>
    %10 = arith.addf %7, %9 : vector<8x128xf32>
    %c0_10 = arith.constant 0 : index
    %c0_11 = arith.constant 0 : index
    %11 = vector.load %arg2[%c0_10, %c0_11] : memref<128x128xf32, #tpu.memory_space<vmem>>, vector<128x128xf32>
    %c0_12 = arith.constant 0 : index
    %c0_13 = arith.constant 0 : index
    %12 = vector.load %arg5[%c0_12, %c0_13] : memref<128x128xf32, #tpu.memory_space<vmem>>, vector<128x128xf32>
    %cst_14 = arith.constant 0.000000e+00 : f32
    %13 = vector.broadcast %cst_14 : f32 to vector<1x128xf32>
    %cst_15 = arith.constant 0.000000e+00 : f32
    %14 = vector.broadcast %cst_15 : f32 to vector<1x128xf32>
    %15 = vector.extract_strided_slice %5 {offsets = [0, 0], sizes = [1, 128], strides = [1, 1]} : vector<8x128xf32> to vector<1x128xf32>
    %cst_16 = arith.constant dense<0.000000e+00> : vector<1x128xf32>
    %16 = tpu.matmul %13, %11, %cst_16 {dimension_numbers = #tpu.dot_dimension_numbers<[1], [0], [0], [1], [0, 0, 1, 1], [], []>} : vector<1x128xf32>, vector<128x128xf32>, vector<1x128xf32> -> vector<1x128xf32>
    %17 = arith.addf %15, %16 : vector<1x128xf32>
    %18 = math.tanh %17 : vector<1x128xf32>
    %19 = vector.extract_strided_slice %10 {offsets = [7, 0], sizes = [1, 128], strides = [1, 1]} : vector<8x128xf32> to vector<1x128xf32>
    %cst_17 = arith.constant dense<0.000000e+00> : vector<1x128xf32>
    %20 = tpu.matmul %14, %12, %cst_17 {dimension_numbers = #tpu.dot_dimension_numbers<[1], [0], [0], [1], [0, 0, 1, 1], [], []>} : vector<1x128xf32>, vector<128x128xf32>, vector<1x128xf32> -> vector<1x128xf32>
    %21 = arith.addf %19, %20 : vector<1x128xf32>
    %22 = math.tanh %21 : vector<1x128xf32>
    %23 = vector.extract_strided_slice %5 {offsets = [1, 0], sizes = [1, 128], strides = [1, 1]} : vector<8x128xf32> to vector<1x128xf32>
    %cst_18 = arith.constant dense<0.000000e+00> : vector<1x128xf32>
    %24 = tpu.matmul %18, %11, %cst_18 {dimension_numbers = #tpu.dot_dimension_numbers<[1], [0], [0], [1], [0, 0, 1, 1], [], []>} : vector<1x128xf32>, vector<128x128xf32>, vector<1x128xf32> -> vector<1x128xf32>
    %25 = arith.addf %23, %24 : vector<1x128xf32>
    %26 = math.tanh %25 : vector<1x128xf32>
    %27 = vector.extract_strided_slice %10 {offsets = [6, 0], sizes = [1, 128], strides = [1, 1]} : vector<8x128xf32> to vector<1x128xf32>
    %cst_19 = arith.constant dense<0.000000e+00> : vector<1x128xf32>
    %28 = tpu.matmul %22, %12, %cst_19 {dimension_numbers = #tpu.dot_dimension_numbers<[1], [0], [0], [1], [0, 0, 1, 1], [], []>} : vector<1x128xf32>, vector<128x128xf32>, vector<1x128xf32> -> vector<1x128xf32>
    %29 = arith.addf %27, %28 : vector<1x128xf32>
    %30 = math.tanh %29 : vector<1x128xf32>
    %31 = vector.extract_strided_slice %5 {offsets = [2, 0], sizes = [1, 128], strides = [1, 1]} : vector<8x128xf32> to vector<1x128xf32>
    %cst_20 = arith.constant dense<0.000000e+00> : vector<1x128xf32>
    %32 = tpu.matmul %26, %11, %cst_20 {dimension_numbers = #tpu.dot_dimension_numbers<[1], [0], [0], [1], [0, 0, 1, 1], [], []>} : vector<1x128xf32>, vector<128x128xf32>, vector<1x128xf32> -> vector<1x128xf32>
    %33 = arith.addf %31, %32 : vector<1x128xf32>
    %34 = math.tanh %33 : vector<1x128xf32>
    %35 = vector.extract_strided_slice %10 {offsets = [5, 0], sizes = [1, 128], strides = [1, 1]} : vector<8x128xf32> to vector<1x128xf32>
    %cst_21 = arith.constant dense<0.000000e+00> : vector<1x128xf32>
    %36 = tpu.matmul %30, %12, %cst_21 {dimension_numbers = #tpu.dot_dimension_numbers<[1], [0], [0], [1], [0, 0, 1, 1], [], []>} : vector<1x128xf32>, vector<128x128xf32>, vector<1x128xf32> -> vector<1x128xf32>
    %37 = arith.addf %35, %36 : vector<1x128xf32>
    %38 = math.tanh %37 : vector<1x128xf32>
    %39 = vector.extract_strided_slice %5 {offsets = [3, 0], sizes = [1, 128], strides = [1, 1]} : vector<8x128xf32> to vector<1x128xf32>
    %cst_22 = arith.constant dense<0.000000e+00> : vector<1x128xf32>
    %40 = tpu.matmul %34, %11, %cst_22 {dimension_numbers = #tpu.dot_dimension_numbers<[1], [0], [0], [1], [0, 0, 1, 1], [], []>} : vector<1x128xf32>, vector<128x128xf32>, vector<1x128xf32> -> vector<1x128xf32>
    %41 = arith.addf %39, %40 : vector<1x128xf32>
    %42 = math.tanh %41 : vector<1x128xf32>
    %43 = vector.extract_strided_slice %10 {offsets = [4, 0], sizes = [1, 128], strides = [1, 1]} : vector<8x128xf32> to vector<1x128xf32>
    %cst_23 = arith.constant dense<0.000000e+00> : vector<1x128xf32>
    %44 = tpu.matmul %38, %12, %cst_23 {dimension_numbers = #tpu.dot_dimension_numbers<[1], [0], [0], [1], [0, 0, 1, 1], [], []>} : vector<1x128xf32>, vector<128x128xf32>, vector<1x128xf32> -> vector<1x128xf32>
    %45 = arith.addf %43, %44 : vector<1x128xf32>
    %46 = math.tanh %45 : vector<1x128xf32>
    %47 = vector.extract_strided_slice %5 {offsets = [4, 0], sizes = [1, 128], strides = [1, 1]} : vector<8x128xf32> to vector<1x128xf32>
    %cst_24 = arith.constant dense<0.000000e+00> : vector<1x128xf32>
    %48 = tpu.matmul %42, %11, %cst_24 {dimension_numbers = #tpu.dot_dimension_numbers<[1], [0], [0], [1], [0, 0, 1, 1], [], []>} : vector<1x128xf32>, vector<128x128xf32>, vector<1x128xf32> -> vector<1x128xf32>
    %49 = arith.addf %47, %48 : vector<1x128xf32>
    %50 = math.tanh %49 : vector<1x128xf32>
    %51 = vector.extract_strided_slice %10 {offsets = [3, 0], sizes = [1, 128], strides = [1, 1]} : vector<8x128xf32> to vector<1x128xf32>
    %cst_25 = arith.constant dense<0.000000e+00> : vector<1x128xf32>
    %52 = tpu.matmul %46, %12, %cst_25 {dimension_numbers = #tpu.dot_dimension_numbers<[1], [0], [0], [1], [0, 0, 1, 1], [], []>} : vector<1x128xf32>, vector<128x128xf32>, vector<1x128xf32> -> vector<1x128xf32>
    %53 = arith.addf %51, %52 : vector<1x128xf32>
    %54 = math.tanh %53 : vector<1x128xf32>
    %55 = vector.extract_strided_slice %5 {offsets = [5, 0], sizes = [1, 128], strides = [1, 1]} : vector<8x128xf32> to vector<1x128xf32>
    %cst_26 = arith.constant dense<0.000000e+00> : vector<1x128xf32>
    %56 = tpu.matmul %50, %11, %cst_26 {dimension_numbers = #tpu.dot_dimension_numbers<[1], [0], [0], [1], [0, 0, 1, 1], [], []>} : vector<1x128xf32>, vector<128x128xf32>, vector<1x128xf32> -> vector<1x128xf32>
    %57 = arith.addf %55, %56 : vector<1x128xf32>
    %58 = math.tanh %57 : vector<1x128xf32>
    %59 = vector.extract_strided_slice %10 {offsets = [2, 0], sizes = [1, 128], strides = [1, 1]} : vector<8x128xf32> to vector<1x128xf32>
    %cst_27 = arith.constant dense<0.000000e+00> : vector<1x128xf32>
    %60 = tpu.matmul %54, %12, %cst_27 {dimension_numbers = #tpu.dot_dimension_numbers<[1], [0], [0], [1], [0, 0, 1, 1], [], []>} : vector<1x128xf32>, vector<128x128xf32>, vector<1x128xf32> -> vector<1x128xf32>
    %61 = arith.addf %59, %60 : vector<1x128xf32>
    %62 = math.tanh %61 : vector<1x128xf32>
    %63 = vector.extract_strided_slice %5 {offsets = [6, 0], sizes = [1, 128], strides = [1, 1]} : vector<8x128xf32> to vector<1x128xf32>
    %cst_28 = arith.constant dense<0.000000e+00> : vector<1x128xf32>
    %64 = tpu.matmul %58, %11, %cst_28 {dimension_numbers = #tpu.dot_dimension_numbers<[1], [0], [0], [1], [0, 0, 1, 1], [], []>} : vector<1x128xf32>, vector<128x128xf32>, vector<1x128xf32> -> vector<1x128xf32>
    %65 = arith.addf %63, %64 : vector<1x128xf32>
    %66 = math.tanh %65 : vector<1x128xf32>
    %67 = vector.extract_strided_slice %10 {offsets = [1, 0], sizes = [1, 128], strides = [1, 1]} : vector<8x128xf32> to vector<1x128xf32>
    %cst_29 = arith.constant dense<0.000000e+00> : vector<1x128xf32>
    %68 = tpu.matmul %62, %12, %cst_29 {dimension_numbers = #tpu.dot_dimension_numbers<[1], [0], [0], [1], [0, 0, 1, 1], [], []>} : vector<1x128xf32>, vector<128x128xf32>, vector<1x128xf32> -> vector<1x128xf32>
    %69 = arith.addf %67, %68 : vector<1x128xf32>
    %70 = math.tanh %69 : vector<1x128xf32>
    %71 = vector.extract_strided_slice %5 {offsets = [7, 0], sizes = [1, 128], strides = [1, 1]} : vector<8x128xf32> to vector<1x128xf32>
    %cst_30 = arith.constant dense<0.000000e+00> : vector<1x128xf32>
    %72 = tpu.matmul %66, %11, %cst_30 {dimension_numbers = #tpu.dot_dimension_numbers<[1], [0], [0], [1], [0, 0, 1, 1], [], []>} : vector<1x128xf32>, vector<128x128xf32>, vector<1x128xf32> -> vector<1x128xf32>
    %73 = arith.addf %71, %72 : vector<1x128xf32>
    %74 = math.tanh %73 : vector<1x128xf32>
    %75 = vector.extract_strided_slice %10 {offsets = [0, 0], sizes = [1, 128], strides = [1, 1]} : vector<8x128xf32> to vector<1x128xf32>
    %cst_31 = arith.constant dense<0.000000e+00> : vector<1x128xf32>
    %76 = tpu.matmul %70, %12, %cst_31 {dimension_numbers = #tpu.dot_dimension_numbers<[1], [0], [0], [1], [0, 0, 1, 1], [], []>} : vector<1x128xf32>, vector<128x128xf32>, vector<1x128xf32> -> vector<1x128xf32>
    %77 = arith.addf %75, %76 : vector<1x128xf32>
    %78 = math.tanh %77 : vector<1x128xf32>
    %79 = tpu.concatenate %18, %26, %34, %42, %50, %58, %66, %74 in 0 : vector<1x128xf32>, vector<1x128xf32>, vector<1x128xf32>, vector<1x128xf32>, vector<1x128xf32>, vector<1x128xf32>, vector<1x128xf32>, vector<1x128xf32> -> vector<8x128xf32>
    %80 = tpu.concatenate %78, %70, %62, %54, %46, %38, %30, %22 in 0 : vector<1x128xf32>, vector<1x128xf32>, vector<1x128xf32>, vector<1x128xf32>, vector<1x128xf32>, vector<1x128xf32>, vector<1x128xf32>, vector<1x128xf32> -> vector<8x128xf32>
    %c0_32 = arith.constant 0 : index
    %c0_33 = arith.constant 0 : index
    %81 = vector.load %arg7[%c0_32, %c0_33] : memref<128x128xf32, #tpu.memory_space<vmem>>, vector<128x128xf32>
    %cst_34 = arith.constant dense<0.000000e+00> : vector<8x128xf32>
    %82 = tpu.matmul %79, %81, %cst_34 {dimension_numbers = #tpu.dot_dimension_numbers<[1], [0], [0], [1], [0, 0, 1, 1], [], []>} : vector<8x128xf32>, vector<128x128xf32>, vector<8x128xf32> -> vector<8x128xf32>
    %c0_35 = arith.constant 0 : index
    %c0_36 = arith.constant 0 : index
    %83 = vector.load %arg8[%c0_35, %c0_36] : memref<128x128xf32, #tpu.memory_space<vmem>>, vector<128x128xf32>
    %cst_37 = arith.constant dense<0.000000e+00> : vector<8x128xf32>
    %84 = tpu.matmul %80, %83, %cst_37 {dimension_numbers = #tpu.dot_dimension_numbers<[1], [0], [0], [1], [0, 0, 1, 1], [], []>} : vector<8x128xf32>, vector<128x128xf32>, vector<8x128xf32> -> vector<8x128xf32>
    %85 = arith.addf %82, %84 : vector<8x128xf32>
    %c0_38 = arith.constant 0 : index
    %c0_39 = arith.constant 0 : index
    %86 = vector.load %arg9[%c0_38, %c0_39] : memref<1x128xf32, #tpu.memory_space<vmem>>, vector<1x128xf32>
    %87 = vector.broadcast %86 : vector<1x128xf32> to vector<8x128xf32>
    %88 = arith.addf %85, %87 : vector<8x128xf32>
    %89 = tpu.iota {dimensions = array<i32: 1>} : vector<8x128xi32>
    %c8_i32 = arith.constant 8 : i32
    %90 = vector.broadcast %c8_i32 : i32 to vector<8x128xi32>
    %91 = arith.cmpi slt, %89, %90 : vector<8x128xi32>
    %cst_40 = arith.constant -1.000000e+30 : f32
    %92 = vector.broadcast %cst_40 : f32 to vector<8x128xf32>
    %93 = arith.select %91, %88, %92 : vector<8x128xi1>, vector<8x128xf32>
    %cst_41 = arith.constant dense<0xFF800000> : vector<8xf32>
    %94 = vector.multi_reduction <maximumf>, %93, %cst_41 [1] : vector<8x128xf32> to vector<8xf32>
    %95 = vector.shape_cast %94 : vector<8xf32> to vector<8x1xf32>
    %96 = vector.broadcast %95 : vector<8x1xf32> to vector<8x128xf32>
    %97 = arith.subf %93, %96 : vector<8x128xf32>
    %98 = math.exp %97 : vector<8x128xf32>
    %cst_42 = arith.constant 0.000000e+00 : f32
    %99 = vector.broadcast %cst_42 : f32 to vector<8x128xf32>
    %100 = arith.select %91, %98, %99 : vector<8x128xi1>, vector<8x128xf32>
    %cst_43 = arith.constant dense<0.000000e+00> : vector<8xf32>
    %101 = vector.multi_reduction <add>, %100, %cst_43 [1] : vector<8x128xf32> to vector<8xf32>
    %102 = vector.shape_cast %101 : vector<8xf32> to vector<8x1xf32>
    %103 = math.log %102 : vector<8x1xf32>
    %104 = vector.broadcast %103 : vector<8x1xf32> to vector<8x128xf32>
    %105 = arith.subf %97, %104 : vector<8x128xf32>
    %c0_44 = arith.constant 0 : index
    %c0_45 = arith.constant 0 : index
    %106 = vector.load %arg10[%c0_44, %c0_45] : memref<8x128xf32, #tpu.memory_space<vmem>>, vector<8x128xf32>
    tpu.vector_store %arg10[%c0_44, %c0_45], %105 {strides = array<i32>} : memref<8x128xf32, #tpu.memory_space<vmem>>, vector<8x128xf32>,
    return
  }
}

</mosaic_0001>

<bundles_post_ra>
// kernel: tpu_custom_call.1
= control target key start
LH: loop header
LB: loop body
LE: loop exit
PB: predicated region body
PF: predicated region fallthrough
CT: control target
= control target key end

     0   :  { %15 = vsyncpa [#allocation3], 0  ;;  %s4014_s0 = inlined_call_operand.hbm [shape: f32[8,128], index: 0, kind: input, shape index: {}]   ;;  %s4015_s1 = inlined_call_operand.hbm [shape: f32[128,128], index: 1, kind: input, shape index: {}]   ;;  %s4016_s2 = inlined_call_operand.hbm [shape: f32[128,128], index: 2, kind: input, shape index: {}]   ;;  %s4017_s3 = inlined_call_operand.vmem [shape: f32[1,128], index: 3, kind: input, shape index: {}]   ;;  %s4018_s4 = inlined_call_operand.hbm [shape: f32[128,128], index: 4, kind: input, shape index: {}]   ;;  %s4019_s5 = inlined_call_operand.hbm [shape: f32[128,128], index: 5, kind: input, shape index: {}]   ;;  %s4020_s6 = inlined_call_operand.vmem [shape: f32[1,128], index: 6, kind: input, shape index: {}]   ;;  %s4021_s7 = inlined_call_operand.hbm [shape: f32[128,128], index: 7, kind: input, shape index: {}]   ;;  %s4022_s8 = inlined_call_operand.hbm [shape: f32[128,128], index: 8, kind: input, shape index: {}]   ;;  %s4023_s9 = inlined_call_operand.vmem [shape: f32[1,128], index: 9, kind: input, shape index: {}]   ;;  %s4024_s10 = inlined_call_operand.hbm [shape: f32[8,128], index: 10, kind: output, shape index: {}]  }
   0x1   :  { %16 = vsyncpa [#allocation6], 0 }
   0x2   :  { %17 = vsyncpa [#allocation9], 0 }
   0x3   :  { %18 = vsyncpa [#allocation12], 0 }
   0x4   :  { %19 = vsyncpa [#allocation4], 0  ;;  %s3109_s13 = smov [#allocation5]  }
   0x5   :  { %s35_s14 = sshll.u32 %s3109_s13, 4  ;;  %s36_s14 = int_to_ptr.vmem [resolvable:$true] %s35_s14 }
   0x6   :  { %s2947_s15 = scalar_lea.vmem %s36_s14, 2048  ;;  %p2952_p1 = scmp.lt.s32.totalorder %s36_s14, %s36_s14 }
   0x7   :  { %p2948_p0 = scmp.ne.s32.totalorder %s36_s14, %s2947_s15  ;;  %p2953_p2 = scmp.lt.s32.totalorder %s2947_s15, %s2947_s15 }
   0x9   :  { %p2954_p3 = por %p2953_p2, %p2952_p1 }
   0xb   :  { %p2955_p4 = pnand %p2954_p3, %p2948_p0 }
   0xd   :  { %2958 = shalt.err (!%p2955_p4)
}
   0xe   :  { %s3110_s16 = smov 128   ;;  %s3111_s17 = smov 8  }
   0xf   :  { %41 = dma.hbm_to_vmem [thread:$0]  %s4015_s1, 2048, %s36_s14, [#allocation6], %s3110_s16, %s3110_s16, %s3111_s17  }
  0x10   :  { %s3112_s20 = smov [#allocation8]   ;;  %s3113_s22 = smov [#allocation11]  }
  0x11   :  { %s61_s21 = sshll.u32 %s3112_s20, 4  ;;  %s87_s23 = sshll.u32 %s3113_s22, 4  ;;  %s62_s21 = int_to_ptr.vmem [resolvable:$true] %s61_s21  ;;  %s88_s23 = int_to_ptr.vmem [resolvable:$true] %s87_s23 }
  0x12   :  { %s2967_s24 = scalar_lea.vmem %s62_s21, 2048  ;;  %p2972_p6 = scmp.lt.s32.totalorder %s62_s21, %s62_s21 }
  0x13   :  { %p2968_p5 = scmp.ne.s32.totalorder %s62_s21, %s2967_s24  ;;  %p2973_p7 = scmp.lt.s32.totalorder %s2967_s24, %s2967_s24 }
  0x15   :  { %p2974_p8 = por %p2973_p7, %p2972_p6 }
  0x17   :  { %p2975_p9 = pnand %p2974_p8, %p2968_p5 }
  0x19   :  { %2978 = shalt.err (!%p2975_p9)
}
  0x1a   :  { %67 = dma.hbm_to_vmem [thread:$0]  %s4018_s4, 2048, %s62_s21, [#allocation9], %s3110_s16, %s3110_s16, %s3111_s17  }
  0x1b   :  { %s2987_s1 = scalar_lea.vmem %s88_s23, 2048  ;;  %p2992_p11 = scmp.lt.s32.totalorder %s88_s23, %s88_s23 }
  0x1c   :  { %p2988_p10 = scmp.ne.s32.totalorder %s88_s23, %s2987_s1  ;;  %p2993_p12 = scmp.lt.s32.totalorder %s2987_s1, %s2987_s1 }
  0x1e   :  { %p2994_p13 = por %p2993_p12, %p2992_p11 }
  0x20   :  { %p2995_p0 = pnand %p2994_p13, %p2988_p10 }
  0x22   :  { %2998 = shalt.err (!%p2995_p0)
}
  0x23   :  { %93 = dma.hbm_to_vmem [thread:$0]  %s4021_s7, 2048, %s88_s23, [#allocation12], %s3110_s16, %s3110_s16, %s3111_s17  }
  0x24   :  { %s3114_s29 = smov [#allocation2]   ;;  %s3115_s11 = smov [#allocation7]  }
  0x25   :  { %s26_s30 = sshll.u32 %s3114_s29, 4  ;;  %s47_s4 = sshll.u32 %s3115_s11, 4  ;;  %s27_s30 = int_to_ptr.vmem [resolvable:$true] %s26_s30  ;;  %s48_s4 = int_to_ptr.vmem [resolvable:$true] %s47_s4 }
  0x26   :  { %s3007_s12 = scalar_lea.vmem %s27_s30, 128  ;;  %p3012_p2 = scmp.lt.s32.totalorder %s27_s30, %s27_s30 }
  0x27   :  { %p3008_p1 = scmp.ne.s32.totalorder %s27_s30, %s3007_s12  ;;  %p3013_p3 = scmp.lt.s32.totalorder %s3007_s12, %s3007_s12 }
  0x29   :  { %p3014_p4 = por %p3013_p3, %p3012_p2 }
  0x2b   :  { %p3015_p5 = pnand %p3014_p4, %p3008_p1 }
  0x2d   :  { %3018 = shalt.err (!%p3015_p5)
}
  0x2e   :  { %29 = dma.hbm_to_vmem [thread:$0]  %s4014_s0, 128, %s27_s30, [#allocation3]  }
  0x2f   :  { %s3027_s15 = scalar_lea.vmem %s48_s4, 2048  ;;  %p3032_p7 = scmp.lt.s32.totalorder %s48_s4, %s48_s4 }
  0x30   :  { %p3028_p6 = scmp.ne.s32.totalorder %s48_s4, %s3027_s15  ;;  %p3033_p8 = scmp.lt.s32.totalorder %s3027_s15, %s3027_s15 }
  0x32   :  { %p3034_p9 = por %p3033_p8, %p3032_p7 }
  0x34   :  { %p3035_p10 = pnand %p3034_p9, %p3028_p6 }
  0x36   :  { %3038 = shalt.err (!%p3035_p10)
}
  0x37   :  { %53 = dma.hbm_to_vmem [thread:$0]  %s4016_s2, 2048, %s48_s4, [#allocation6], %s3110_s16, %s3110_s16, %s3111_s17  }
  0x38   :  { %s3116_s19 = smov [#allocation10]   ;;  %s3117_s21 = smov [#allocation13]  }
  0x39   :  { %s73_s20 = sshll.u32 %s3116_s19, 4  ;;  %s99_s0 = sshll.u32 %s3117_s21, 4  ;;  %s74_s20 = int_to_ptr.vmem [resolvable:$true] %s73_s20  ;;  %s100_s0 = int_to_ptr.vmem [resolvable:$true] %s99_s0 }
  0x3a   :  { %s3047_s22 = scalar_lea.vmem %s74_s20, 2048  ;;  %p3052_p12 = scmp.lt.s32.totalorder %s74_s20, %s74_s20 }
  0x3b   :  { %p3048_p11 = scmp.ne.s32.totalorder %s74_s20, %s3047_s22  ;;  %p3053_p13 = scmp.lt.s32.totalorder %s3047_s22, %s3047_s22 }
  0x3d   :  { %p3054_p0 = por %p3053_p13, %p3052_p12 }
  0x3f   :  { %p3055_p1 = pnand %p3054_p0, %p3048_p11 }
  0x41   :  { %3058 = shalt.err (!%p3055_p1)
}
  0x42   :  { %79 = dma.hbm_to_vmem [thread:$0]  %s4019_s5, 2048, %s74_s20, [#allocation9], %s3110_s16, %s3110_s16, %s3111_s17  }
  0x43   :  { %s3067_s2 = scalar_lea.vmem %s100_s0, 2048  ;;  %p3072_p3 = scmp.lt.s32.totalorder %s100_s0, %s100_s0 }
  0x44   :  { %p3068_p2 = scmp.ne.s32.totalorder %s100_s0, %s3067_s2  ;;  %p3073_p4 = scmp.lt.s32.totalorder %s3067_s2, %s3067_s2 }
  0x46   :  { %p3074_p5 = por %p3073_p4, %p3072_p3 }
  0x48   :  { %p3075_p6 = pnand %p3074_p5, %p3068_p2 }
  0x4a   :  { %3078 = shalt.err (!%p3075_p6)
}
  0x4b   :  { %105 = dma.hbm_to_vmem [thread:$0]  %s4022_s8, 2048, %s100_s0, [#allocation12], %s3110_s16, %s3110_s16, %s3111_s17  }
  0x4c   :  { %3099 = dma.done.wait [#allocation3], 128  }
  0x4d   :  { %3100 = vsyncadd [#allocation3], 4294967168 }
  0x4e   :  { %3101 = dma.done.wait [#allocation6], 4096  }
  0x4f   :  { %3102 = vsyncadd [#allocation6], 4294963200 }
  0x50   :  { %3103 = dma.done.wait [#allocation9], 4096  }
  0x51   :  { %3104 = vsyncadd [#allocation9], 4294963200 }
  0x52   :  { %3105 = dma.done.wait [#allocation12], 4096  }
  0x53   :  { %3106 = vsyncadd [#allocation12], 4294963200  ;;  %v3118_v0 = vmov 0.0   ;;  %vm3119_vm0 = vmmov 0   ;;  %v145_v1 = vld [vmem:[#allocation5 + $0x78] sm:$0xff]  ;;  %v144_v3 = vld [vmem:[#allocation5 + $0x70] sm:$0xff] }
  0x54   :  { %2159 = vmatprep.subr.mxu0 %v3118_v0  ;;  %2194 = vmatprep.subr.mxu1 %v3118_v0  ;;  %v238_v2 = vld [vmem:[#allocation8 + $0x78] sm:$0xff]  ;;  %v237_v4 = vld [vmem:[#allocation8 + $0x70] sm:$0xff]  ;;  %v143_v5 = vld [vmem:[#allocation5 + $0x68] sm:$0xff]  ;;  %vm1581_vm1 = vcmask 1040384   ;;  %vm1583_vm2 = vcmask 1041408   ;;  %vm1585_vm3 = vcmask 1042432  }
  0x55   :  { %2226 = vmatprep.mubr.msk.f32.mxu1 %vm3119_vm0, %v3118_v0  ;;  %2191 = vmatprep.mubr.msk.f32.mxu0 %vm3119_vm0, %v3118_v0  ;;  %v236_v6 = vld [vmem:[#allocation8 + $0x68] sm:$0xff]  ;;  %v142_v7 = vld [vmem:[#allocation5 + $0x60] sm:$0xff]  ;;  %v141_v9 = vld [vmem:[#allocation5 + $0x58] sm:$0xff]  ;;  %vm1587_vm4 = vcmask 1043456   ;;  %vm1589_vm5 = vcmask 1044480   ;;  %vm1591_vm6 = vcmask 1045504  }
  0x56   :  { %2160 = vmatpush3.msra.mxu0 %v145_v1  ;;  %2195 = vmatpush3.msra.mxu1 %v238_v2  ;;  %v235_v8 = vld [vmem:[#allocation8 + $0x60] sm:$0xff]  ;;  %v234_v10 = vld [vmem:[#allocation8 + $0x58] sm:$0xff]  ;;  %v140_v11 = vld [vmem:[#allocation5 + $0x50] sm:$0xff]  ;;  %vm1593_vm7 = vcmask 1046528   ;;  %s3120_s1 = smov [#allocation14]  }
  0x57   :  { %2161 = vmatprep.subr.mxu0 %v3118_v0  ;;  %2196 = vmatprep.subr.mxu1 %v3118_v0  ;;  %v233_v12 = vld [vmem:[#allocation8 + $0x50] sm:$0xff]  ;;  %v139_v13 = vld [vmem:[#allocation5 + $0x48] sm:$0xff]  ;;  %v138_v15 = vld [vmem:[#allocation5 + $0x40] sm:$0xff]  ;;  %s1804_s27 = sshll.u32 %s3120_s1, 4  ;;  %s1805_s27 = int_to_ptr.vmem [resolvable:$true] %s1804_s27 }
  0x58   :  { %2162 = vmatpush3.msra.mxu0 %v144_v3  ;;  %2197 = vmatpush3.msra.mxu1 %v237_v4  ;;  %v232_v14 = vld [vmem:[#allocation8 + $0x48] sm:$0xff]  ;;  %v231_v16 = vld [vmem:[#allocation8 + $0x40] sm:$0xff]  ;;  %v137_v17 = vld [vmem:[#allocation5 + $0x38] sm:$0xff]  ;;  %p3084_p8 = scmp.lt.s32.totalorder %s1805_s27, %s1805_s27 }
  0x59   :  { %2163 = vmatprep.subr.mxu0 %v3118_v0  ;;  %2198 = vmatprep.subr.mxu1 %v3118_v0  ;;  %v230_v18 = vld [vmem:[#allocation8 + $0x38] sm:$0xff]  ;;  %v136_v19 = vld [vmem:[#allocation5 + $0x30] sm:$0xff]  ;;  %v135_v21 = vld [vmem:[#allocation5 + $0x28] sm:$0xff] }
  0x5a   :  { %2164 = vmatpush3.msra.mxu0 %v143_v5  ;;  %2199 = vmatpush3.msra.mxu1 %v236_v6  ;;  %v229_v20 = vld [vmem:[#allocation8 + $0x30] sm:$0xff]  ;;  %v228_v22 = vld [vmem:[#allocation8 + $0x28] sm:$0xff]  ;;  %v134_v23 = vld [vmem:[#allocation5 + $0x20] sm:$0xff] }
  0x5b   :  { %2165 = vmatprep.subr.mxu0 %v3118_v0  ;;  %2200 = vmatprep.subr.mxu1 %v3118_v0  ;;  %v227_v24 = vld [vmem:[#allocation8 + $0x20] sm:$0xff]  ;;  %v133_v25 = vld [vmem:[#allocation5 + $0x18] sm:$0xff]  ;;  %v132_v27 = vld [vmem:[#allocation5 + $0x10] sm:$0xff] }
  0x5c   :  { %2166 = vmatpush3.msra.mxu0 %v142_v7  ;;  %2201 = vmatpush3.msra.mxu1 %v235_v8  ;;  %v226_v26 = vld [vmem:[#allocation8 + $0x18] sm:$0xff]  ;;  %v225_v28 = vld [vmem:[#allocation8 + $0x10] sm:$0xff]  ;;  %v131_v29 = vld [vmem:[#allocation5 + $0x8] sm:$0xff] }
  0x5d   :  { %2167 = vmatprep.subr.mxu0 %v3118_v0  ;;  %2202 = vmatprep.subr.mxu1 %v3118_v0  ;;  %v224_v30 = vld [vmem:[#allocation8 + $0x8] sm:$0xff]  ;;  %v130_v31 = vld [vmem:[#allocation5] sm:$0xff]  ;;  %v129_v33 = vld [vmem:[#allocation2] sm:$0xff] }
  0x5e   :  { %2168 = vmatpush3.msra.mxu0 %v141_v9  ;;  %2203 = vmatpush3.msra.mxu1 %v234_v10  ;;  %v223_v32 = vld [vmem:[#allocation8] sm:$0xff]  ;;  %v3251_v34 = vld [vmem:[#allocation7 + $0x78] sm:$0xff]  ;;  %v3257_v36 = vld [vmem:[#allocation7 + $0x70] sm:$0xff] }
  0x5f   :  { %2169 = vmatprep.subr.mxu0 %v3118_v0  ;;  %2204 = vmatprep.subr.mxu1 %v3118_v0  ;;  %v3253_v35 = vld [vmem:[#allocation10 + $0x78] sm:$0xff]  ;;  %v3259_v37 = vld [vmem:[#allocation10 + $0x70] sm:$0xff]  ;;  %v3265_v38 = vld [vmem:[#allocation7 + $0x68] sm:$0xff] }
  0x60   :  { %2170 = vmatpush3.msra.mxu0 %v140_v11  ;;  %2205 = vmatpush3.msra.mxu1 %v233_v12  ;;  %v3267_v39 = vld [vmem:[#allocation10 + $0x68] sm:$0xff]  ;;  %v3273_v40 = vld [vmem:[#allocation7 + $0x60] sm:$0xff]  ;;  %v3281_v42 = vld [vmem:[#allocation7 + $0x58] sm:$0xff] }
  0x61   :  { %2171 = vmatprep.subr.mxu0 %v3118_v0  ;;  %2206 = vmatprep.subr.mxu1 %v3118_v0  ;;  %v3275_v41 = vld [vmem:[#allocation10 + $0x60] sm:$0xff]  ;;  %v3283_v43 = vld [vmem:[#allocation10 + $0x58] sm:$0xff]  ;;  %v3289_v44 = vld [vmem:[#allocation7 + $0x50] sm:$0xff] }
  0x62   :  { %2172 = vmatpush3.msra.mxu0 %v139_v13  ;;  %2207 = vmatpush3.msra.mxu1 %v232_v14  ;;  %v3291_v45 = vld [vmem:[#allocation10 + $0x50] sm:$0xff]  ;;  %v3297_v46 = vld [vmem:[#allocation7 + $0x48] sm:$0xff]  ;;  %v3305_v48 = vld [vmem:[#allocation7 + $0x40] sm:$0xff] }
  0x63   :  { %2173 = vmatprep.subr.mxu0 %v3118_v0  ;;  %2208 = vmatprep.subr.mxu1 %v3118_v0  ;;  %v3299_v47 = vld [vmem:[#allocation10 + $0x48] sm:$0xff]  ;;  %v3307_v49 = vld [vmem:[#allocation10 + $0x40] sm:$0xff]  ;;  %v3313_v50 = vld [vmem:[#allocation7 + $0x38] sm:$0xff] }
  0x64   :  { %2174 = vmatpush3.msra.mxu0 %v138_v15  ;;  %2209 = vmatpush3.msra.mxu1 %v231_v16  ;;  %v3315_v51 = vld [vmem:[#allocation10 + $0x38] sm:$0xff]  ;;  %v3321_v52 = vld [vmem:[#allocation7 + $0x30] sm:$0xff]  ;;  %v3329_v54 = vld [vmem:[#allocation7 + $0x28] sm:$0xff] }
  0x65   :  { %2175 = vmatprep.subr.mxu0 %v3118_v0  ;;  %2210 = vmatprep.subr.mxu1 %v3118_v0  ;;  %v3323_v53 = vld [vmem:[#allocation10 + $0x30] sm:$0xff]  ;;  %v3331_v55 = vld [vmem:[#allocation10 + $0x28] sm:$0xff]  ;;  %v3337_v56 = vld [vmem:[#allocation7 + $0x20] sm:$0xff] }
  0x66   :  { %2176 = vmatpush3.msra.mxu0 %v137_v17  ;;  %2211 = vmatpush3.msra.mxu1 %v230_v18  ;;  %v3339_v57 = vld [vmem:[#allocation10 + $0x20] sm:$0xff]  ;;  %v3345_v58 = vld [vmem:[#allocation7 + $0x18] sm:$0xff]  ;;  %v3353_v60 = vld [vmem:[#allocation7 + $0x10] sm:$0xff] }
  0x67   :  { %2177 = vmatprep.subr.mxu0 %v3118_v0  ;;  %2212 = vmatprep.subr.mxu1 %v3118_v0  ;;  %v3347_v59 = vld [vmem:[#allocation10 + $0x18] sm:$0xff]  ;;  %v3355_v61 = vld [vmem:[#allocation10 + $0x10] sm:$0xff]  ;;  %v3361_v62 = vld [vmem:[#allocation7 + $0x8] sm:$0xff] }
  0x68   :  { %2178 = vmatpush3.msra.mxu0 %v136_v19  ;;  %2213 = vmatpush3.msra.mxu1 %v229_v20  ;;  %v3363_v63 = vld [vmem:[#allocation10 + $0x8] sm:$0xff]  ;;  %v3369_v1 = vld [vmem:[#allocation7] sm:$0xff]  ;;  %v1816_v7 = vld [vmem:[%s4017_s3] ss:$0 sm:$0xff] }
  0x69   :  { %2179 = vmatprep.subr.mxu0 %v3118_v0  ;;  %2214 = vmatprep.subr.mxu1 %v3118_v0  ;;  %v3373_v2 = vld [vmem:[#allocation10] sm:$0xff]  ;;  %v1817_v8 = vld [vmem:[%s4020_s6] ss:$0 sm:$0xff] }
  0x6a   :  { %2180 = vmatpush3.msra.mxu0 %v135_v21  ;;  %2215 = vmatpush3.msra.mxu1 %v228_v22 }
  0x6b   :  { %2181 = vmatprep.subr.mxu0 %v3118_v0  ;;  %2216 = vmatprep.subr.mxu1 %v3118_v0 }
  0x6c   :  { %2182 = vmatpush3.msra.mxu0 %v134_v23  ;;  %2217 = vmatpush3.msra.mxu1 %v227_v24 }
  0x6d   :  { %2183 = vmatprep.subr.mxu0 %v3118_v0  ;;  %2218 = vmatprep.subr.mxu1 %v3118_v0 }
  0x6e   :  { %2184 = vmatpush3.msra.mxu0 %v133_v25  ;;  %2219 = vmatpush3.msra.mxu1 %v226_v26 }
  0x6f   :  { %2185 = vmatprep.subr.mxu0 %v3118_v0  ;;  %2220 = vmatprep.subr.mxu1 %v3118_v0 }
  0x70   :  { %2186 = vmatpush3.msra.mxu0 %v132_v27  ;;  %2221 = vmatpush3.msra.mxu1 %v225_v28 }
  0x71   :  { %2187 = vmatprep.subr.mxu0 %v3118_v0  ;;  %2222 = vmatprep.subr.mxu1 %v3118_v0 }
  0x72   :  { %2188 = vmatpush3.msra.mxu0 %v131_v29  ;;  %2223 = vmatpush3.msra.mxu1 %v224_v30 }
  0x73   :  { %2189 = vmatprep.subr.mxu0 %v3118_v0  ;;  %2224 = vmatprep.subr.mxu1 %v3118_v0 }
  0x74   :  { %2190 = vmatpush3.msra.mxu0 %v130_v31  ;;  %2225 = vmatpush3.msra.mxu1 %v223_v32 }
  0x75   :  { %2227 = vmatmul.mubr.f32.vlgmr.msra.gmra.mxu1 %v129_v33  ;;  %2229 = vmatprep.subr.mxu0 %v3118_v0 }
  0x76   :  { %2264 = vmatprep.subr.mxu1 %v3118_v0  ;;  %2192 = vmatmul.mubr.f32.vlgmr.msra.gmra.mxu0 %v129_v33 }
  0x77   :  { %2230 = vmatpush3.msra.mxu0 %v3251_v34  ;;  %2265 = vmatpush3.msra.mxu1 %v3253_v35 }
  0x78   :  { %2231 = vmatprep.subr.mxu0 %v3118_v0  ;;  %2266 = vmatprep.subr.mxu1 %v3118_v0 }
  0x79   :  { %2232 = vmatpush3.msra.mxu0 %v3257_v36  ;;  %2267 = vmatpush3.msra.mxu1 %v3259_v37 }
  0x7a   :  { %2233 = vmatprep.subr.mxu0 %v3118_v0  ;;  %2268 = vmatprep.subr.mxu1 %v3118_v0 }
  0x7b   :  { %2234 = vmatpush3.msra.mxu0 %v3265_v38  ;;  %2269 = vmatpush3.msra.mxu1 %v3267_v39 }
  0x7c   :  { %2235 = vmatprep.subr.mxu0 %v3118_v0  ;;  %2270 = vmatprep.subr.mxu1 %v3118_v0 }
  0x7d   :  { %2236 = vmatpush3.msra.mxu0 %v3273_v40  ;;  %2271 = vmatpush3.msra.mxu1 %v3275_v41 }
  0x7e   :  { %2237 = vmatprep.subr.mxu0 %v3118_v0  ;;  %2272 = vmatprep.subr.mxu1 %v3118_v0 }
  0x7f   :  { %2238 = vmatpush3.msra.mxu0 %v3281_v42  ;;  %2273 = vmatpush3.msra.mxu1 %v3283_v43 }
  0x80   :  { %2239 = vmatprep.subr.mxu0 %v3118_v0  ;;  %2274 = vmatprep.subr.mxu1 %v3118_v0 }
  0x81   :  { %2240 = vmatpush3.msra.mxu0 %v3289_v44  ;;  %2275 = vmatpush3.msra.mxu1 %v3291_v45 }
  0x82   :  { %2241 = vmatprep.subr.mxu0 %v3118_v0  ;;  %2276 = vmatprep.subr.mxu1 %v3118_v0 }
  0x83   :  { %2242 = vmatpush3.msra.mxu0 %v3297_v46  ;;  %2277 = vmatpush3.msra.mxu1 %v3299_v47 }
  0x84   :  { %2243 = vmatprep.subr.mxu0 %v3118_v0  ;;  %2278 = vmatprep.subr.mxu1 %v3118_v0 }
  0x85   :  { %2244 = vmatpush3.msra.mxu0 %v3305_v48  ;;  %2279 = vmatpush3.msra.mxu1 %v3307_v49 }
  0x86   :  { %2245 = vmatprep.subr.mxu0 %v3118_v0  ;;  %2280 = vmatprep.subr.mxu1 %v3118_v0 }
  0x87   :  { %2246 = vmatpush3.msra.mxu0 %v3313_v50  ;;  %2281 = vmatpush3.msra.mxu1 %v3315_v51 }
  0x88   :  { %2247 = vmatprep.subr.mxu0 %v3118_v0  ;;  %2282 = vmatprep.subr.mxu1 %v3118_v0 }
  0x89   :  { %2248 = vmatpush3.msra.mxu0 %v3321_v52  ;;  %2283 = vmatpush3.msra.mxu1 %v3323_v53 }
  0x8a   :  { %2249 = vmatprep.subr.mxu0 %v3118_v0  ;;  %2284 = vmatprep.subr.mxu1 %v3118_v0 }
  0x8b   :  { %2250 = vmatpush3.msra.mxu0 %v3329_v54  ;;  %2285 = vmatpush3.msra.mxu1 %v3331_v55 }
  0x8c   :  { %2251 = vmatprep.subr.mxu0 %v3118_v0  ;;  %2286 = vmatprep.subr.mxu1 %v3118_v0 }
  0x8d   :  { %2252 = vmatpush3.msra.mxu0 %v3337_v56  ;;  %2287 = vmatpush3.msra.mxu1 %v3339_v57 }
  0x8e   :  { %2253 = vmatprep.subr.mxu0 %v3118_v0  ;;  %2288 = vmatprep.subr.mxu1 %v3118_v0 }
  0x8f   :  { %2254 = vmatpush3.msra.mxu0 %v3345_v58  ;;  %2289 = vmatpush3.msra.mxu1 %v3347_v59 }
  0x90   :  { %2255 = vmatprep.subr.mxu0 %v3118_v0  ;;  %2290 = vmatprep.subr.mxu1 %v3118_v0 }
  0x91   :  { %2256 = vmatpush3.msra.mxu0 %v3353_v60  ;;  %2291 = vmatpush3.msra.mxu1 %v3355_v61 }
  0x92   :  { %2257 = vmatprep.subr.mxu0 %v3118_v0  ;;  %2292 = vmatprep.subr.mxu1 %v3118_v0 }
  0x93   :  { %2258 = vmatpush3.msra.mxu0 %v3361_v62  ;;  %2293 = vmatpush3.msra.mxu1 %v3363_v63 }
  0x94   :  { %2259 = vmatprep.subr.mxu0 %v3118_v0  ;;  %2294 = vmatprep.subr.mxu1 %v3118_v0 }
  0x95   :  { %2260 = vmatpush3.msra.mxu0 %v3369_v1  ;;  %2261 = vmatprep.mubr.msk.f32.mxu0 %vm3119_vm0, %v3118_v0 }
  0x96   :  { %2295 = vmatpush3.msra.mxu1 %v3373_v2  ;;  %2296 = vmatprep.mubr.msk.f32.mxu1 %vm3119_vm0, %v3118_v0 }
  0x97   :  { %2262 = vmatmul.mubr.f32.vlgmr.msra.gmra.mxu0 %v3118_v0  ;;  %2297 = vmatmul.mubr.f32.vlgmr.msra.gmra.mxu1 %v3118_v0 }
  0x98   :  { %2299 = vmatprep.subr.mxu0 %v3118_v0  ;;  %2334 = vmatprep.subr.mxu1 %v3118_v0 }
  0x99   :  { %2300 = vmatpush3.msra.mxu0 %v3251_v34  ;;  %2335 = vmatpush3.msra.mxu1 %v3253_v35 }
  0x9a   :  { %2301 = vmatprep.subr.mxu0 %v3118_v0  ;;  %2336 = vmatprep.subr.mxu1 %v3118_v0 }
  0x9b   :  { %2302 = vmatpush3.msra.mxu0 %v3257_v36  ;;  %2337 = vmatpush3.msra.mxu1 %v3259_v37 }
  0x9c   :  { %2303 = vmatprep.subr.mxu0 %v3118_v0  ;;  %2338 = vmatprep.subr.mxu1 %v3118_v0 }
  0x9d   :  { %2304 = vmatpush3.msra.mxu0 %v3265_v38  ;;  %2339 = vmatpush3.msra.mxu1 %v3267_v39 }
  0x9e   :  { %2305 = vmatprep.subr.mxu0 %v3118_v0  ;;  %2340 = vmatprep.subr.mxu1 %v3118_v0 }
  0x9f   :  { %2306 = vmatpush3.msra.mxu0 %v3273_v40  ;;  %2341 = vmatpush3.msra.mxu1 %v3275_v41 }
  0xa0   :  { %2307 = vmatprep.subr.mxu0 %v3118_v0  ;;  %2342 = vmatprep.subr.mxu1 %v3118_v0 }
  0xa1   :  { %2308 = vmatpush3.msra.mxu0 %v3281_v42  ;;  %2343 = vmatpush3.msra.mxu1 %v3283_v43 }
  0xa2   :  { %2309 = vmatprep.subr.mxu0 %v3118_v0  ;;  %2344 = vmatprep.subr.mxu1 %v3118_v0 }
  0xa3   :  { %2310 = vmatpush3.msra.mxu0 %v3289_v44  ;;  %2345 = vmatpush3.msra.mxu1 %v3291_v45 }
  0xa4   :  { %2311 = vmatprep.subr.mxu0 %v3118_v0  ;;  %2346 = vmatprep.subr.mxu1 %v3118_v0 }
  0xa5   :  { %2312 = vmatpush3.msra.mxu0 %v3297_v46  ;;  %2347 = vmatpush3.msra.mxu1 %v3299_v47 }
  0xa6   :  { %2313 = vmatprep.subr.mxu0 %v3118_v0  ;;  %2348 = vmatprep.subr.mxu1 %v3118_v0 }
  0xa7   :  { %2314 = vmatpush3.msra.mxu0 %v3305_v48  ;;  %2349 = vmatpush3.msra.mxu1 %v3307_v49 }
  0xa8   :  { %2315 = vmatprep.subr.mxu0 %v3118_v0  ;;  %2350 = vmatprep.subr.mxu1 %v3118_v0 }
  0xa9   :  { %2316 = vmatpush3.msra.mxu0 %v3313_v50  ;;  %2351 = vmatpush3.msra.mxu1 %v3315_v51 }
  0xaa   :  { %2317 = vmatprep.subr.mxu0 %v3118_v0  ;;  %2352 = vmatprep.subr.mxu1 %v3118_v0 }
  0xab   :  { %2318 = vmatpush3.msra.mxu0 %v3321_v52  ;;  %2353 = vmatpush3.msra.mxu1 %v3323_v53 }
  0xac   :  { %2319 = vmatprep.subr.mxu0 %v3118_v0  ;;  %2354 = vmatprep.subr.mxu1 %v3118_v0 }
  0xad   :  { %2320 = vmatpush3.msra.mxu0 %v3329_v54  ;;  %2355 = vmatpush3.msra.mxu1 %v3331_v55 }
  0xae   :  { %2321 = vmatprep.subr.mxu0 %v3118_v0  ;;  %2356 = vmatprep.subr.mxu1 %v3118_v0 }
  0xaf   :  { %2322 = vmatpush3.msra.mxu0 %v3337_v56  ;;  %2357 = vmatpush3.msra.mxu1 %v3339_v57 }
  0xb0   :  { %2323 = vmatprep.subr.mxu0 %v3118_v0  ;;  %2358 = vmatprep.subr.mxu1 %v3118_v0 }
  0xb1   :  { %2324 = vmatpush3.msra.mxu0 %v3345_v58  ;;  %2359 = vmatpush3.msra.mxu1 %v3347_v59 }
  0xb2   :  { %2325 = vmatprep.subr.mxu0 %v3118_v0  ;;  %2360 = vmatprep.subr.mxu1 %v3118_v0 }
  0xb3   :  { %2326 = vmatpush3.msra.mxu0 %v3353_v60  ;;  %2331 = vmatprep.mubr.msk.f32.mxu0 %vm3119_vm0, %v3118_v0 }
  0xb4   :  { %2327 = vmatprep.subr.mxu0 %v3118_v0  ;;  %2361 = vmatpush3.msra.mxu1 %v3355_v61 }
  0xb5   :  { %2328 = vmatpush3.msra.mxu0 %v3361_v62  ;;  %2362 = vmatprep.subr.mxu1 %v3118_v0 }
  0xb6   :  { %2329 = vmatprep.subr.mxu0 %v3118_v0  ;;  %2363 = vmatpush3.msra.mxu1 %v3363_v63 }
  0xb7   :  { %2330 = vmatpush3.msra.mxu0 %v3369_v1  ;;  %2364 = vmatprep.subr.mxu1 %v3118_v0 }
  0xb8   :  { %2365 = vmatpush3.msra.mxu1 %v3373_v2  ;;  %2366 = vmatprep.mubr.msk.f32.mxu1 %vm3119_vm0, %v3118_v0 }
  0xb9   :  { %2369 = vmatprep.subr.mxu0 %v3118_v0  ;;  %2404 = vmatprep.subr.mxu1 %v3118_v0 }
 0x135   :  { %v312_v3 = vpop.f32.mrf.mxu1 }
 0x136   :  { %v219_v4 = vpop.f32.mrf.mxu0  ;;  %v3463_v12 = vadd.f32 %v1817_v8, %v312_v3 }
 0x137   :  { %v2228_v5 = vpop.f32.mrf.mxu1  ;;  %v3461_v9 = vadd.f32 %v1816_v7, %v219_v4 }
 0x138   :  { %v2193_v6 = vpop.f32.mrf.mxu0 }
 0x157   :  { %v414_v10 = vpop.f32.mrf.mxu0  ;;  %v486_v11 = vpop.f32.mrf.mxu1 }
 0x158   :  { %v418_v13 = vadd.f32 %v414_v10, %v3461_v9  ;;  %v491_v14 = vrot.slane %v486_v11, 1 }
 0x159   :  { %v2298_v15 = vpop.f32.mrf.mxu1  ;;  %v2263_v16 = vpop.f32.mrf.mxu0 }
 0x15a   :  { %2871 = vtanh.f32 %v418_v13  ;;  %v493_v17 = vadd.f32 %v491_v14, %v3463_v12 }
 0x15c   :  { %2873 = vtanh.f32 %v493_v17 }
 0x167   :  { %v3467_v18 = vpop.eup %2871 }
 0x168   :  { %2332 = vmatmul.mubr.f32.vlgmr.msra.gmra.mxu0 %v3467_v18 }
 0x169   :  { %v3470_v19 = vpop.eup %2873  ;;  %2370 = vmatpush3.msra.mxu0 %v3251_v34  ;;  %2401 = vmatprep.mubr.msk.f32.mxu0 %vm3119_vm0, %v3118_v0 }
 0x16a   :  { %v571_v20 = vrot.slane %v3470_v19, 7  ;;  %2371 = vmatprep.subr.mxu0 %v3118_v0 }
 0x16b   :  { %2372 = vmatpush3.msra.mxu0 %v3257_v36 }
 0x16c   :  { %2367 = vmatmul.mubr.f32.vlgmr.msra.gmra.mxu1 %v571_v20  ;;  %2373 = vmatprep.subr.mxu0 %v3118_v0 }
 0x16d   :  { %2374 = vmatpush3.msra.mxu0 %v3265_v38  ;;  %2405 = vmatpush3.msra.mxu1 %v3253_v35 }
 0x16e   :  { %2375 = vmatprep.subr.mxu0 %v3118_v0  ;;  %2406 = vmatprep.subr.mxu1 %v3118_v0 }
 0x16f   :  { %2376 = vmatpush3.msra.mxu0 %v3273_v40  ;;  %2407 = vmatpush3.msra.mxu1 %v3259_v37 }
 0x170   :  { %2377 = vmatprep.subr.mxu0 %v3118_v0  ;;  %2408 = vmatprep.subr.mxu1 %v3118_v0 }
 0x171   :  { %2378 = vmatpush3.msra.mxu0 %v3281_v42  ;;  %2409 = vmatpush3.msra.mxu1 %v3267_v39 }
 0x172   :  { %2379 = vmatprep.subr.mxu0 %v3118_v0  ;;  %2410 = vmatprep.subr.mxu1 %v3118_v0 }
 0x173   :  { %2380 = vmatpush3.msra.mxu0 %v3289_v44  ;;  %2411 = vmatpush3.msra.mxu1 %v3275_v41 }
 0x174   :  { %2381 = vmatprep.subr.mxu0 %v3118_v0  ;;  %2412 = vmatprep.subr.mxu1 %v3118_v0 }
 0x175   :  { %2382 = vmatpush3.msra.mxu0 %v3297_v46  ;;  %2413 = vmatpush3.msra.mxu1 %v3283_v43 }
 0x176   :  { %2383 = vmatprep.subr.mxu0 %v3118_v0  ;;  %2414 = vmatprep.subr.mxu1 %v3118_v0 }
 0x177   :  { %2384 = vmatpush3.msra.mxu0 %v3305_v48  ;;  %2415 = vmatpush3.msra.mxu1 %v3291_v45 }
 0x178   :  { %2385 = vmatprep.subr.mxu0 %v3118_v0  ;;  %2416 = vmatprep.subr.mxu1 %v3118_v0 }
 0x179   :  { %2386 = vmatpush3.msra.mxu0 %v3313_v50  ;;  %2417 = vmatpush3.msra.mxu1 %v3299_v47 }
 0x17a   :  { %2387 = vmatprep.subr.mxu0 %v3118_v0  ;;  %2418 = vmatprep.subr.mxu1 %v3118_v0 }
 0x17b   :  { %2388 = vmatpush3.msra.mxu0 %v3321_v52  ;;  %2419 = vmatpush3.msra.mxu1 %v3307_v49 }
 0x17c   :  { %2389 = vmatprep.subr.mxu0 %v3118_v0  ;;  %2420 = vmatprep.subr.mxu1 %v3118_v0 }
 0x17d   :  { %2390 = vmatpush3.msra.mxu0 %v3329_v54  ;;  %2421 = vmatpush3.msra.mxu1 %v3315_v51 }
 0x17e   :  { %2391 = vmatprep.subr.mxu0 %v3118_v0  ;;  %2422 = vmatprep.subr.mxu1 %v3118_v0 }
 0x17f   :  { %2392 = vmatpush3.msra.mxu0 %v3337_v56  ;;  %2423 = vmatpush3.msra.mxu1 %v3323_v53 }
 0x180   :  { %2393 = vmatprep.subr.mxu0 %v3118_v0  ;;  %2424 = vmatprep.subr.mxu1 %v3118_v0 }
 0x181   :  { %2394 = vmatpush3.msra.mxu0 %v3345_v58  ;;  %2425 = vmatpush3.msra.mxu1 %v3331_v55 }
 0x182   :  { %2395 = vmatprep.subr.mxu0 %v3118_v0  ;;  %2426 = vmatprep.subr.mxu1 %v3118_v0 }
 0x183   :  { %2396 = vmatpush3.msra.mxu0 %v3353_v60  ;;  %2427 = vmatpush3.msra.mxu1 %v3339_v57 }
 0x184   :  { %2397 = vmatprep.subr.mxu0 %v3118_v0  ;;  %2428 = vmatprep.subr.mxu1 %v3118_v0 }
 0x185   :  { %2398 = vmatpush3.msra.mxu0 %v3361_v62  ;;  %2429 = vmatpush3.msra.mxu1 %v3347_v59 }
 0x186   :  { %2399 = vmatprep.subr.mxu0 %v3118_v0  ;;  %2430 = vmatprep.subr.mxu1 %v3118_v0 }
 0x187   :  { %2400 = vmatpush3.msra.mxu0 %v3369_v1  ;;  %2431 = vmatpush3.msra.mxu1 %v3355_v61 }
 0x188   :  { %2432 = vmatprep.subr.mxu1 %v3118_v0  ;;  %2436 = vmatprep.mubr.msk.f32.mxu1 %vm3119_vm0, %v3118_v0 }
 0x189   :  { %2433 = vmatpush3.msra.mxu1 %v3363_v63  ;;  %2439 = vmatprep.subr.mxu0 %v3118_v0 }
 0x18a   :  { %2434 = vmatprep.subr.mxu1 %v3118_v0 }
 0x18b   :  { %2435 = vmatpush3.msra.mxu1 %v3373_v2 }
 0x18c   :  { %2474 = vmatprep.subr.mxu1 %v3118_v0 }
 0x228   :  { %v561_v21 = vpop.f32.mrf.mxu0 }
 0x229   :  { %v566_v22 = vrot.slane %v561_v21, 7 }
 0x22a   :  { %v2333_v23 = vpop.f32.mrf.mxu0 }
 0x22b   :  { %v568_v24 = vadd.f32 %v566_v22, %v3461_v9 }
 0x22c   :  { %v639_v25 = vpop.f32.mrf.mxu1 }
 0x22d   :  { %2875 = vtanh.f32 %v568_v24  ;;  %v644_v26 = vrot.slane %v639_v25, 2 }
 0x22e   :  { %v2368_v27 = vpop.f32.mrf.mxu1 }
 0x22f   :  { %v646_v28 = vadd.f32 %v644_v26, %v3463_v12 }
 0x231   :  { %2877 = vtanh.f32 %v646_v28 }
 0x23a   :  { %v3543_v29 = vpop.eup %2875 }
 0x23b   :  { %v649_v30 = vrot.slane %v3543_v29, 1  ;;  %v1582_v13 = vsel %vm1581_vm1, %v3467_v18, %v3543_v29 }
 0x23d   :  { %2402 = vmatmul.mubr.f32.vlgmr.msra.gmra.mxu0 %v649_v30 }
 0x23e   :  { %v3546_v31 = vpop.eup %2877  ;;  %2440 = vmatpush3.msra.mxu0 %v3251_v34  ;;  %2471 = vmatprep.mubr.msk.f32.mxu0 %vm3119_vm0, %v3118_v0 }
 0x23f   :  { %v727_v32 = vrot.slane %v3546_v31, 6  ;;  %2441 = vmatprep.subr.mxu0 %v3118_v0 }
 0x240   :  { %2442 = vmatpush3.msra.mxu0 %v3257_v36 }
 0x241   :  { %2437 = vmatmul.mubr.f32.vlgmr.msra.gmra.mxu1 %v727_v32  ;;  %2443 = vmatprep.subr.mxu0 %v3118_v0 }
 0x242   :  { %2444 = vmatpush3.msra.mxu0 %v3265_v38  ;;  %2475 = vmatpush3.msra.mxu1 %v3253_v35 }
 0x243   :  { %2445 = vmatprep.subr.mxu0 %v3118_v0  ;;  %2476 = vmatprep.subr.mxu1 %v3118_v0 }
 0x244   :  { %2446 = vmatpush3.msra.mxu0 %v3273_v40  ;;  %2477 = vmatpush3.msra.mxu1 %v3259_v37 }
 0x245   :  { %2447 = vmatprep.subr.mxu0 %v3118_v0  ;;  %2478 = vmatprep.subr.mxu1 %v3118_v0 }
 0x246   :  { %2448 = vmatpush3.msra.mxu0 %v3281_v42  ;;  %2479 = vmatpush3.msra.mxu1 %v3267_v39 }
 0x247   :  { %2449 = vmatprep.subr.mxu0 %v3118_v0  ;;  %2480 = vmatprep.subr.mxu1 %v3118_v0 }
 0x248   :  { %2450 = vmatpush3.msra.mxu0 %v3289_v44  ;;  %2481 = vmatpush3.msra.mxu1 %v3275_v41 }
 0x249   :  { %2451 = vmatprep.subr.mxu0 %v3118_v0  ;;  %2482 = vmatprep.subr.mxu1 %v3118_v0 }
 0x24a   :  { %2452 = vmatpush3.msra.mxu0 %v3297_v46  ;;  %2483 = vmatpush3.msra.mxu1 %v3283_v43 }
 0x24b   :  { %2453 = vmatprep.subr.mxu0 %v3118_v0  ;;  %2484 = vmatprep.subr.mxu1 %v3118_v0 }
 0x24c   :  { %2454 = vmatpush3.msra.mxu0 %v3305_v48  ;;  %2485 = vmatpush3.msra.mxu1 %v3291_v45 }
 0x24d   :  { %2455 = vmatprep.subr.mxu0 %v3118_v0  ;;  %2486 = vmatprep.subr.mxu1 %v3118_v0 }
 0x24e   :  { %2456 = vmatpush3.msra.mxu0 %v3313_v50  ;;  %2487 = vmatpush3.msra.mxu1 %v3299_v47 }
 0x24f   :  { %2457 = vmatprep.subr.mxu0 %v3118_v0  ;;  %2488 = vmatprep.subr.mxu1 %v3118_v0 }
 0x250   :  { %2458 = vmatpush3.msra.mxu0 %v3321_v52  ;;  %2489 = vmatpush3.msra.mxu1 %v3307_v49 }
 0x251   :  { %2459 = vmatprep.subr.mxu0 %v3118_v0  ;;  %2490 = vmatprep.subr.mxu1 %v3118_v0 }
 0x252   :  { %2460 = vmatpush3.msra.mxu0 %v3329_v54  ;;  %2491 = vmatpush3.msra.mxu1 %v3315_v51 }
 0x253   :  { %2461 = vmatprep.subr.mxu0 %v3118_v0  ;;  %2492 = vmatprep.subr.mxu1 %v3118_v0 }
 0x254   :  { %2462 = vmatpush3.msra.mxu0 %v3337_v56  ;;  %2493 = vmatpush3.msra.mxu1 %v3323_v53 }
 0x255   :  { %2463 = vmatprep.subr.mxu0 %v3118_v0  ;;  %2494 = vmatprep.subr.mxu1 %v3118_v0 }
 0x256   :  { %2464 = vmatpush3.msra.mxu0 %v3345_v58  ;;  %2495 = vmatpush3.msra.mxu1 %v3331_v55 }
 0x257   :  { %2465 = vmatprep.subr.mxu0 %v3118_v0  ;;  %2496 = vmatprep.subr.mxu1 %v3118_v0 }
 0x258   :  { %2466 = vmatpush3.msra.mxu0 %v3353_v60  ;;  %2497 = vmatpush3.msra.mxu1 %v3339_v57 }
 0x259   :  { %2467 = vmatprep.subr.mxu0 %v3118_v0  ;;  %2498 = vmatprep.subr.mxu1 %v3118_v0 }
 0x25a   :  { %2468 = vmatpush3.msra.mxu0 %v3361_v62  ;;  %2499 = vmatpush3.msra.mxu1 %v3347_v59 }
 0x25b   :  { %2469 = vmatprep.subr.mxu0 %v3118_v0  ;;  %2500 = vmatprep.subr.mxu1 %v3118_v0 }
 0x25c   :  { %2470 = vmatpush3.msra.mxu0 %v3369_v1  ;;  %2501 = vmatpush3.msra.mxu1 %v3355_v61 }
 0x25d   :  { %2502 = vmatprep.subr.mxu1 %v3118_v0  ;;  %2506 = vmatprep.mubr.msk.f32.mxu1 %vm3119_vm0, %v3118_v0 }
 0x25e   :  { %2503 = vmatpush3.msra.mxu1 %v3363_v63  ;;  %2509 = vmatprep.subr.mxu0 %v3118_v0 }
 0x25f   :  { %2504 = vmatprep.subr.mxu1 %v3118_v0 }
 0x260   :  { %2505 = vmatpush3.msra.mxu1 %v3373_v2 }
 0x261   :  { %2544 = vmatprep.subr.mxu1 %v3118_v0 }
 0x2fd   :  { %v717_v33 = vpop.f32.mrf.mxu0 }
 0x2fe   :  { %v722_v3 = vrot.slane %v717_v33, 6  ;;  %v3803_v33 = vld [vmem:[#allocation10 + $0x70] sm:$0xff] }
 0x2ff   :  { %v2403_v4 = vpop.f32.mrf.mxu0 }
 0x300   :  { %v724_v5 = vadd.f32 %v722_v3, %v3461_v9  ;;  %v3808_v3 = vld [vmem:[#allocation7 + $0x58] sm:$0xff]  ;;  %v3811_v4 = vld [vmem:[#allocation10 + $0x68] sm:$0xff] }
 0x301   :  { %v795_v6 = vpop.f32.mrf.mxu1 }
 0x302   :  { %2879 = vtanh.f32 %v724_v5  ;;  %v800_v7 = vrot.slane %v795_v6, 3  ;;  %v3816_v5 = vld [vmem:[#allocation7 + $0x50] sm:$0xff]  ;;  %v3819_v6 = vld [vmem:[#allocation10 + $0x60] sm:$0xff] }
 0x303   :  { %v2438_v8 = vpop.f32.mrf.mxu1 }
 0x304   :  { %v802_v10 = vadd.f32 %v800_v7, %v3463_v12  ;;  %v3824_v7 = vld [vmem:[#allocation7 + $0x48] sm:$0xff]  ;;  %v3827_v8 = vld [vmem:[#allocation10 + $0x58] sm:$0xff] }
 0x306   :  { %2881 = vtanh.f32 %v802_v10  ;;  %v3833_v10 = vld [vmem:[#allocation10 + $0x50] sm:$0xff] }
 0x30f   :  { %v2880_v11 = vpop.eup %2879 }
 0x310   :  { %v805_v14 = vrot.slane %v2880_v11, 2  ;;  %v3623_v15 = vsel %vm1583_vm2, %v1582_v13, %v2880_v11  ;;  %v3839_v11 = vld [vmem:[#allocation10 + $0x48] sm:$0xff] }
 0x312   :  { %2472 = vmatmul.mubr.f32.vlgmr.msra.gmra.mxu0 %v805_v14 }
 0x313   :  { %v3625_v16 = vpop.eup %2881  ;;  %2510 = vmatpush3.msra.mxu0 %v3251_v34  ;;  %2541 = vmatprep.mubr.msk.f32.mxu0 %vm3119_vm0, %v3118_v0 }
 0x314   :  { %v883_v17 = vrot.slane %v3625_v16, 5  ;;  %2511 = vmatprep.subr.mxu0 %v3118_v0 }
 0x315   :  { %2512 = vmatpush3.msra.mxu0 %v3257_v36 }
 0x316   :  { %2507 = vmatmul.mubr.f32.vlgmr.msra.gmra.mxu1 %v883_v17  ;;  %2513 = vmatprep.subr.mxu0 %v3118_v0  ;;  %v2925_v17 = vld [vmem:[#allocation7 + $0x40] sm:$0xff] }
 0x317   :  { %2514 = vmatpush3.msra.mxu0 %v3265_v38  ;;  %2545 = vmatpush3.msra.mxu1 %v3253_v35 }
 0x318   :  { %2515 = vmatprep.subr.mxu0 %v3118_v0  ;;  %2546 = vmatprep.subr.mxu1 %v3118_v0 }
 0x319   :  { %2516 = vmatpush3.msra.mxu0 %v3273_v40  ;;  %2547 = vmatpush3.msra.mxu1 %v3259_v37 }
 0x31a   :  { %2517 = vmatprep.subr.mxu0 %v3118_v0  ;;  %2548 = vmatprep.subr.mxu1 %v3118_v0 }
 0x31b   :  { %2518 = vmatpush3.msra.mxu0 %v3281_v42  ;;  %2549 = vmatpush3.msra.mxu1 %v3267_v39 }
 0x31c   :  { %2519 = vmatprep.subr.mxu0 %v3118_v0  ;;  %2550 = vmatprep.subr.mxu1 %v3118_v0 }
 0x31d   :  { %2520 = vmatpush3.msra.mxu0 %v3289_v44  ;;  %2551 = vmatpush3.msra.mxu1 %v3275_v41 }
 0x31e   :  { %2521 = vmatprep.subr.mxu0 %v3118_v0  ;;  %2552 = vmatprep.subr.mxu1 %v3118_v0 }
 0x31f   :  { %2522 = vmatpush3.msra.mxu0 %v3297_v46  ;;  %2553 = vmatpush3.msra.mxu1 %v3283_v43 }
 0x320   :  { %2523 = vmatprep.subr.mxu0 %v3118_v0  ;;  %2554 = vmatprep.subr.mxu1 %v3118_v0 }
 0x321   :  { %2524 = vmatpush3.msra.mxu0 %v3305_v48  ;;  %2555 = vmatpush3.msra.mxu1 %v3291_v45 }
 0x322   :  { %2525 = vmatprep.subr.mxu0 %v3118_v0  ;;  %2556 = vmatprep.subr.mxu1 %v3118_v0 }
 0x323   :  { %2526 = vmatpush3.msra.mxu0 %v3313_v50  ;;  %2557 = vmatpush3.msra.mxu1 %v3299_v47 }
 0x324   :  { %2527 = vmatprep.subr.mxu0 %v3118_v0  ;;  %2558 = vmatprep.subr.mxu1 %v3118_v0 }
 0x325   :  { %2528 = vmatpush3.msra.mxu0 %v3321_v52  ;;  %2559 = vmatpush3.msra.mxu1 %v3307_v49 }
 0x326   :  { %2529 = vmatprep.subr.mxu0 %v3118_v0  ;;  %2560 = vmatprep.subr.mxu1 %v3118_v0 }
 0x327   :  { %2530 = vmatpush3.msra.mxu0 %v3329_v54  ;;  %2561 = vmatpush3.msra.mxu1 %v3315_v51 }
 0x328   :  { %2531 = vmatprep.subr.mxu0 %v3118_v0  ;;  %2562 = vmatprep.subr.mxu1 %v3118_v0 }
 0x329   :  { %2532 = vmatpush3.msra.mxu0 %v3337_v56  ;;  %2563 = vmatpush3.msra.mxu1 %v3323_v53 }
 0x32a   :  { %2533 = vmatprep.subr.mxu0 %v3118_v0  ;;  %2564 = vmatprep.subr.mxu1 %v3118_v0 }
 0x32b   :  { %2534 = vmatpush3.msra.mxu0 %v3345_v58  ;;  %2565 = vmatpush3.msra.mxu1 %v3331_v55 }
 0x32c   :  { %2535 = vmatprep.subr.mxu0 %v3118_v0  ;;  %2566 = vmatprep.subr.mxu1 %v3118_v0 }
 0x32d   :  { %2536 = vmatpush3.msra.mxu0 %v3353_v60  ;;  %2567 = vmatpush3.msra.mxu1 %v3339_v57 }
 0x32e   :  { %2537 = vmatprep.subr.mxu0 %v3118_v0  ;;  %2568 = vmatprep.subr.mxu1 %v3118_v0 }
 0x32f   :  { %2538 = vmatpush3.msra.mxu0 %v3361_v62  ;;  %2569 = vmatpush3.msra.mxu1 %v3347_v59 }
 0x330   :  { %2539 = vmatprep.subr.mxu0 %v3118_v0  ;;  %2570 = vmatprep.subr.mxu1 %v3118_v0 }
 0x331   :  { %2540 = vmatpush3.msra.mxu0 %v3369_v1  ;;  %2571 = vmatpush3.msra.mxu1 %v3355_v61 }
 0x332   :  { %2572 = vmatprep.subr.mxu1 %v3118_v0  ;;  %2576 = vmatprep.mubr.msk.f32.mxu1 %vm3119_vm0, %v3118_v0 }
 0x333   :  { %2573 = vmatpush3.msra.mxu1 %v3363_v63  ;;  %2579 = vmatprep.subr.mxu0 %v3118_v0 }
 0x334   :  { %2574 = vmatprep.subr.mxu1 %v3118_v0 }
 0x335   :  { %2575 = vmatpush3.msra.mxu1 %v3373_v2 }
 0x336   :  { %2614 = vmatprep.subr.mxu1 %v3118_v0 }
 0x3d2   :  { %v873_v18 = vpop.f32.mrf.mxu0 }
 0x3d3   :  { %v878_v20 = vrot.slane %v873_v18, 5  ;;  %v2926_v18 = vld [vmem:[#allocation7 + $0x38] sm:$0xff] }
 0x3d4   :  { %v2473_v21 = vpop.f32.mrf.mxu0 }
 0x3d5   :  { %v880_v22 = vadd.f32 %v878_v20, %v3461_v9  ;;  %v2927_v20 = vld [vmem:[#allocation7 + $0x30] sm:$0xff]  ;;  %v2928_v21 = vld [vmem:[#allocation7 + $0x28] sm:$0xff] }
 0x3d6   :  { %v951_v23 = vpop.f32.mrf.mxu1 }
 0x3d7   :  { %2883 = vtanh.f32 %v880_v22  ;;  %v956_v24 = vrot.slane %v951_v23, 4  ;;  %v2929_v22 = vld [vmem:[#allocation7 + $0x20] sm:$0xff]  ;;  %v2930_v23 = vld [vmem:[#allocation7 + $0x18] sm:$0xff] }
 0x3d8   :  { %v2508_v25 = vpop.f32.mrf.mxu1 }
 0x3d9   :  { %v958_v26 = vadd.f32 %v956_v24, %v3463_v12  ;;  %v2931_v24 = vld [vmem:[#allocation7 + $0x10] sm:$0xff]  ;;  %v2932_v25 = vld [vmem:[#allocation10 + $0x20] sm:$0xff] }
 0x3db   :  { %2885 = vtanh.f32 %v958_v26  ;;  %v2933_v26 = vld [vmem:[#allocation7 + $0x8] sm:$0xff] }
 0x3e4   :  { %v2884_v27 = vpop.eup %2883 }
 0x3e5   :  { %v961_v28 = vrot.slane %v2884_v27, 3  ;;  %v3700_v29 = vsel %vm1585_vm3, %v3623_v15, %v2884_v27  ;;  %v2934_v27 = vld [vmem:[#allocation10 + $0x18] sm:$0xff] }
 0x3e7   :  { %2542 = vmatmul.mubr.f32.vlgmr.msra.gmra.mxu0 %v961_v28  ;;  %v2935_v28 = vld [vmem:[#allocation7] sm:$0xff] }
 0x3e8   :  { %v3702_v30 = vpop.eup %2885  ;;  %2580 = vmatpush3.msra.mxu0 %v3251_v34  ;;  %2611 = vmatprep.mubr.msk.f32.mxu0 %vm3119_vm0, %v3118_v0 }
 0x3e9   :  { %v1039_v32 = vrot.slane %v3702_v30, 4  ;;  %2581 = vmatprep.subr.mxu0 %v3118_v0 }
 0x3ea   :  { %2582 = vmatpush3.msra.mxu0 %v3257_v36 }
 0x3eb   :  { %2577 = vmatmul.mubr.f32.vlgmr.msra.gmra.mxu1 %v1039_v32  ;;  %2583 = vmatprep.subr.mxu0 %v3118_v0  ;;  %v2937_v32 = vld [vmem:[#allocation10 + $0x8] sm:$0xff] }
 0x3ec   :  { %2584 = vmatpush3.msra.mxu0 %v3265_v38  ;;  %2615 = vmatpush3.msra.mxu1 %v3253_v35 }
 0x3ed   :  { %2585 = vmatprep.subr.mxu0 %v3118_v0  ;;  %2616 = vmatprep.subr.mxu1 %v3118_v0 }
 0x3ee   :  { %2586 = vmatpush3.msra.mxu0 %v3273_v40  ;;  %2617 = vmatpush3.msra.mxu1 %v3259_v37 }
 0x3ef   :  { %2587 = vmatprep.subr.mxu0 %v3118_v0  ;;  %2618 = vmatprep.subr.mxu1 %v3118_v0 }
 0x3f0   :  { %2588 = vmatpush3.msra.mxu0 %v3281_v42  ;;  %2619 = vmatpush3.msra.mxu1 %v3267_v39 }
 0x3f1   :  { %2589 = vmatprep.subr.mxu0 %v3118_v0  ;;  %2620 = vmatprep.subr.mxu1 %v3118_v0 }
 0x3f2   :  { %2590 = vmatpush3.msra.mxu0 %v3289_v44  ;;  %2621 = vmatpush3.msra.mxu1 %v3275_v41 }
 0x3f3   :  { %2591 = vmatprep.subr.mxu0 %v3118_v0  ;;  %2622 = vmatprep.subr.mxu1 %v3118_v0 }
 0x3f4   :  { %2592 = vmatpush3.msra.mxu0 %v3297_v46  ;;  %2623 = vmatpush3.msra.mxu1 %v3283_v43  ;;  %v3781_v46 = vld [vmem:[#allocation7 + $0x78] sm:$0xff] }
 0x3f5   :  { %2593 = vmatprep.subr.mxu0 %v3118_v0  ;;  %2624 = vmatprep.subr.mxu1 %v3118_v0 }
 0x3f6   :  { %2594 = vmatpush3.msra.mxu0 %v3305_v48  ;;  %2625 = vmatpush3.msra.mxu1 %v3291_v45 }
 0x3f7   :  { %2595 = vmatprep.subr.mxu0 %v3118_v0  ;;  %2626 = vmatprep.subr.mxu1 %v3118_v0 }
 0x3f8   :  { %2596 = vmatpush3.msra.mxu0 %v3313_v50  ;;  %2627 = vmatpush3.msra.mxu1 %v3299_v47 }
 0x3f9   :  { %2597 = vmatprep.subr.mxu0 %v3118_v0  ;;  %2628 = vmatprep.subr.mxu1 %v3118_v0 }
 0x3fa   :  { %2598 = vmatpush3.msra.mxu0 %v3321_v52  ;;  %2629 = vmatpush3.msra.mxu1 %v3307_v49  ;;  %v3788_v49 = vld [vmem:[#allocation7 + $0x70] sm:$0xff] }
 0x3fb   :  { %2599 = vmatprep.subr.mxu0 %v3118_v0  ;;  %2630 = vmatprep.subr.mxu1 %v3118_v0 }
 0x3fc   :  { %2600 = vmatpush3.msra.mxu0 %v3329_v54  ;;  %2631 = vmatpush3.msra.mxu1 %v3315_v51  ;;  %v3792_v51 = vld [vmem:[#allocation7 + $0x68] sm:$0xff] }
 0x3fd   :  { %2601 = vmatprep.subr.mxu0 %v3118_v0  ;;  %2632 = vmatprep.subr.mxu1 %v3118_v0 }
 0x3fe   :  { %2602 = vmatpush3.msra.mxu0 %v3337_v56  ;;  %2633 = vmatpush3.msra.mxu1 %v3323_v53  ;;  %v3795_v53 = vld [vmem:[#allocation10 + $0x78] sm:$0xff] }
 0x3ff   :  { %2603 = vmatprep.subr.mxu0 %v3118_v0  ;;  %2634 = vmatprep.subr.mxu1 %v3118_v0 }
 0x400   :  { %2604 = vmatpush3.msra.mxu0 %v3345_v58  ;;  %2635 = vmatpush3.msra.mxu1 %v3331_v55  ;;  %v3800_v55 = vld [vmem:[#allocation7 + $0x60] sm:$0xff] }
 0x401   :  { %2605 = vmatprep.subr.mxu0 %v3118_v0  ;;  %2636 = vmatprep.subr.mxu1 %v3118_v0 }
 0x402   :  { %2606 = vmatpush3.msra.mxu0 %v3353_v60  ;;  %2637 = vmatpush3.msra.mxu1 %v3339_v57 }
 0x403   :  { %2607 = vmatprep.subr.mxu0 %v3118_v0  ;;  %2638 = vmatprep.subr.mxu1 %v3118_v0 }
 0x404   :  { %2608 = vmatpush3.msra.mxu0 %v3361_v62  ;;  %2639 = vmatpush3.msra.mxu1 %v3347_v59 }
 0x405   :  { %2609 = vmatprep.subr.mxu0 %v3118_v0  ;;  %2640 = vmatprep.subr.mxu1 %v3118_v0 }
 0x406   :  { %2610 = vmatpush3.msra.mxu0 %v3369_v1  ;;  %2641 = vmatpush3.msra.mxu1 %v3355_v61 }
 0x407   :  { %2642 = vmatprep.subr.mxu1 %v3118_v0  ;;  %2646 = vmatprep.mubr.msk.f32.mxu1 %vm3119_vm0, %v3118_v0 }
 0x408   :  { %2643 = vmatpush3.msra.mxu1 %v3363_v63  ;;  %2649 = vmatprep.subr.mxu0 %v3118_v0 }
 0x409   :  { %2644 = vmatprep.subr.mxu1 %v3118_v0 }
 0x40a   :  { %2645 = vmatpush3.msra.mxu1 %v3373_v2 }
 0x40b   :  { %2684 = vmatprep.subr.mxu1 %v3118_v0 }
 0x4a7   :  { %v1029_v34 = vpop.f32.mrf.mxu0 }
 0x4a8   :  { %v1034_v35 = vrot.slane %v1029_v34, 4  ;;  %v2938_v34 = vld [vmem:[#allocation10] sm:$0xff] }
 0x4a9   :  { %v2543_v36 = vpop.f32.mrf.mxu0 }
 0x4aa   :  { %v1036_v37 = vadd.f32 %v1034_v35, %v3461_v9 }
 0x4ab   :  { %v1107_v38 = vpop.f32.mrf.mxu1 }
 0x4ac   :  { %2887 = vtanh.f32 %v1036_v37  ;;  %v1112_v39 = vrot.slane %v1107_v38, 5 }
 0x4ad   :  { %v2578_v40 = vpop.f32.mrf.mxu1 }
 0x4ae   :  { %v1114_v41 = vadd.f32 %v1112_v39, %v3463_v12 }
 0x4b0   :  { %2889 = vtanh.f32 %v1114_v41 }
 0x4b9   :  { %v2888_v42 = vpop.eup %2887 }
 0x4ba   :  { %v1117_v43 = vrot.slane %v2888_v42, 4  ;;  %v3777_v44 = vsel %vm1587_vm4, %v3700_v29, %v2888_v42  ;;  %v2936_v29 = vld [vmem:[#allocation10 + $0x10] sm:$0xff] }
 0x4bc   :  { %2612 = vmatmul.mubr.f32.vlgmr.msra.gmra.mxu0 %v1117_v43 }
 0x4bd   :  { %v3779_v45 = vpop.eup %2889  ;;  %2650 = vmatpush3.msra.mxu0 %v3781_v46  ;;  %2681 = vmatprep.mubr.msk.f32.mxu0 %vm3119_vm0, %v3118_v0 }
 0x4be   :  { %v1195_v47 = vrot.slane %v3779_v45, 3  ;;  %2651 = vmatprep.subr.mxu0 %v3118_v0 }
 0x4bf   :  { %2652 = vmatpush3.msra.mxu0 %v3788_v49 }
 0x4c0   :  { %2647 = vmatmul.mubr.f32.vlgmr.msra.gmra.mxu1 %v1195_v47  ;;  %2653 = vmatprep.subr.mxu0 %v3118_v0 }
 0x4c1   :  { %2654 = vmatpush3.msra.mxu0 %v3792_v51  ;;  %2685 = vmatpush3.msra.mxu1 %v3795_v53 }
 0x4c2   :  { %2655 = vmatprep.subr.mxu0 %v3118_v0  ;;  %2686 = vmatprep.subr.mxu1 %v3118_v0 }
 0x4c3   :  { %2656 = vmatpush3.msra.mxu0 %v3800_v55  ;;  %2687 = vmatpush3.msra.mxu1 %v3803_v33 }
 0x4c4   :  { %2657 = vmatprep.subr.mxu0 %v3118_v0  ;;  %2688 = vmatprep.subr.mxu1 %v3118_v0 }
 0x4c5   :  { %2658 = vmatpush3.msra.mxu0 %v3808_v3  ;;  %2689 = vmatpush3.msra.mxu1 %v3811_v4 }
 0x4c6   :  { %2659 = vmatprep.subr.mxu0 %v3118_v0  ;;  %2690 = vmatprep.subr.mxu1 %v3118_v0 }
 0x4c7   :  { %2660 = vmatpush3.msra.mxu0 %v3816_v5  ;;  %2691 = vmatpush3.msra.mxu1 %v3819_v6 }
 0x4c8   :  { %2661 = vmatprep.subr.mxu0 %v3118_v0  ;;  %2692 = vmatprep.subr.mxu1 %v3118_v0 }
 0x4c9   :  { %2662 = vmatpush3.msra.mxu0 %v3824_v7  ;;  %2693 = vmatpush3.msra.mxu1 %v3827_v8 }
 0x4ca   :  { %2663 = vmatprep.subr.mxu0 %v3118_v0  ;;  %2694 = vmatprep.subr.mxu1 %v3118_v0 }
 0x4cb   :  { %2664 = vmatpush3.msra.mxu0 %v3305_v48  ;;  %2695 = vmatpush3.msra.mxu1 %v3833_v10  ;;  %v3845_v48 = vld [vmem:[#allocation10 + $0x40] sm:$0xff] }
 0x4cc   :  { %2665 = vmatprep.subr.mxu0 %v3118_v0  ;;  %2696 = vmatprep.subr.mxu1 %v3118_v0 }
 0x4cd   :  { %2666 = vmatpush3.msra.mxu0 %v3313_v50  ;;  %2697 = vmatpush3.msra.mxu1 %v3839_v11  ;;  %v3851_v50 = vld [vmem:[#allocation10 + $0x38] sm:$0xff] }
 0x4ce   :  { %2667 = vmatprep.subr.mxu0 %v3118_v0  ;;  %2698 = vmatprep.subr.mxu1 %v3118_v0 }
 0x4cf   :  { %2668 = vmatpush3.msra.mxu0 %v3321_v52  ;;  %2699 = vmatpush3.msra.mxu1 %v3845_v48  ;;  %v3857_v52 = vld [vmem:[#allocation10 + $0x30] sm:$0xff] }
 0x4d0   :  { %2669 = vmatprep.subr.mxu0 %v3118_v0  ;;  %2700 = vmatprep.subr.mxu1 %v3118_v0 }
 0x4d1   :  { %2670 = vmatpush3.msra.mxu0 %v3329_v54  ;;  %2701 = vmatpush3.msra.mxu1 %v3851_v50  ;;  %v3863_v54 = vld [vmem:[#allocation10 + $0x28] sm:$0xff] }
 0x4d2   :  { %2671 = vmatprep.subr.mxu0 %v3118_v0  ;;  %2702 = vmatprep.subr.mxu1 %v3118_v0 }
 0x4d3   :  { %2672 = vmatpush3.msra.mxu0 %v3337_v56  ;;  %2703 = vmatpush3.msra.mxu1 %v3857_v52 }
 0x4d4   :  { %2673 = vmatprep.subr.mxu0 %v3118_v0  ;;  %2704 = vmatprep.subr.mxu1 %v3118_v0 }
 0x4d5   :  { %2674 = vmatpush3.msra.mxu0 %v3345_v58  ;;  %2705 = vmatpush3.msra.mxu1 %v3863_v54 }
 0x4d6   :  { %2675 = vmatprep.subr.mxu0 %v3118_v0  ;;  %2706 = vmatprep.subr.mxu1 %v3118_v0 }
 0x4d7   :  { %2676 = vmatpush3.msra.mxu0 %v3353_v60  ;;  %2707 = vmatpush3.msra.mxu1 %v3339_v57 }
 0x4d8   :  { %2677 = vmatprep.subr.mxu0 %v3118_v0  ;;  %2708 = vmatprep.subr.mxu1 %v3118_v0 }
 0x4d9   :  { %2678 = vmatpush3.msra.mxu0 %v3361_v62  ;;  %2709 = vmatpush3.msra.mxu1 %v3347_v59 }
 0x4da   :  { %2679 = vmatprep.subr.mxu0 %v3118_v0  ;;  %2710 = vmatprep.subr.mxu1 %v3118_v0 }
 0x4db   :  { %2680 = vmatpush3.msra.mxu0 %v3369_v1  ;;  %2711 = vmatpush3.msra.mxu1 %v3355_v61 }
 0x4dc   :  { %2712 = vmatprep.subr.mxu1 %v3118_v0  ;;  %2716 = vmatprep.mubr.msk.f32.mxu1 %vm3119_vm0, %v3118_v0 }
 0x4dd   :  { %2713 = vmatpush3.msra.mxu1 %v3363_v63  ;;  %2719 = vmatprep.subr.mxu0 %v3118_v0 }
 0x4de   :  { %2714 = vmatprep.subr.mxu1 %v3118_v0 }
 0x4df   :  { %2715 = vmatpush3.msra.mxu1 %v3373_v2 }
 0x4e0   :  { %2754 = vmatprep.subr.mxu1 %v3118_v0 }
 0x57c   :  { %v1185_v56 = vpop.f32.mrf.mxu0 }
 0x57d   :  { %v1190_v57 = vrot.slane %v1185_v56, 3  ;;  %v1627_v56 = vld [vmem:[#allocation13 + $0x48] sm:$0xff] }
 0x57e   :  { %v2613_v58 = vpop.f32.mrf.mxu0 }
 0x57f   :  { %v1192_v59 = vadd.f32 %v1190_v57, %v3461_v9  ;;  %v1607_v57 = vld [vmem:[#allocation11 + $0x28] sm:$0xff]  ;;  %v1626_v58 = vld [vmem:[#allocation13 + $0x40] sm:$0xff] }
 0x580   :  { %v1263_v60 = vpop.f32.mrf.mxu1 }
 0x581   :  { %2891 = vtanh.f32 %v1192_v59  ;;  %v1268_v61 = vrot.slane %v1263_v60, 6  ;;  %v1606_v59 = vld [vmem:[#allocation11 + $0x20] sm:$0xff]  ;;  %v1625_v60 = vld [vmem:[#allocation13 + $0x38] sm:$0xff] }
 0x582   :  { %v2648_v62 = vpop.f32.mrf.mxu1 }
 0x583   :  { %v1270_v1 = vadd.f32 %v1268_v61, %v3463_v12  ;;  %v1605_v61 = vld [vmem:[#allocation11 + $0x18] sm:$0xff]  ;;  %v1624_v62 = vld [vmem:[#allocation13 + $0x30] sm:$0xff] }
 0x585   :  { %2893 = vtanh.f32 %v1270_v1  ;;  %v1604_v1 = vld [vmem:[#allocation11 + $0x10] sm:$0xff] }
 0x58e   :  { %v2892_v63 = vpop.eup %2891 }
 0x58f   :  { %v1273_v13 = vrot.slane %v2892_v63, 5  ;;  %v3890_v2 = vsel %vm1589_vm5, %v3777_v44, %v2892_v63  ;;  %v1623_v63 = vld [vmem:[#allocation13 + $0x28] sm:$0xff] }
 0x591   :  { %2682 = vmatmul.mubr.f32.vlgmr.msra.gmra.mxu0 %v1273_v13  ;;  %v1603_v13 = vld [vmem:[#allocation11 + $0x8] sm:$0xff] }
 0x592   :  { %v3892_v14 = vpop.eup %2893  ;;  %2720 = vmatpush3.msra.mxu0 %v3781_v46  ;;  %2751 = vmatprep.mubr.msk.f32.mxu0 %vm3119_vm0, %v3118_v0  ;;  %v1633_v46 = vld [vmem:[#allocation13 + $0x78] sm:$0xff] }
 0x593   :  { %v1351_v15 = vrot.slane %v3892_v14, 2  ;;  %2721 = vmatprep.subr.mxu0 %v3118_v0 }
 0x594   :  { %2722 = vmatpush3.msra.mxu0 %v3788_v49  ;;  %v1632_v49 = vld [vmem:[#allocation13 + $0x70] sm:$0xff] }
 0x595   :  { %2717 = vmatmul.mubr.f32.vlgmr.msra.gmra.mxu1 %v1351_v15  ;;  %2723 = vmatprep.subr.mxu0 %v3118_v0  ;;  %v1602_v15 = vld [vmem:[#allocation11] sm:$0xff] }
 0x596   :  { %2724 = vmatpush3.msra.mxu0 %v3792_v51  ;;  %2755 = vmatpush3.msra.mxu1 %v3795_v53 }
 0x597   :  { %2725 = vmatprep.subr.mxu0 %v3118_v0  ;;  %2756 = vmatprep.subr.mxu1 %v3118_v0 }
 0x598   :  { %2726 = vmatpush3.msra.mxu0 %v3800_v55  ;;  %2757 = vmatpush3.msra.mxu1 %v3803_v33  ;;  %v1617_v55 = vld [vmem:[#allocation11 + $0x78] sm:$0xff]  ;;  %v1616_v33 = vld [vmem:[#allocation11 + $0x70] sm:$0xff] }
 0x599   :  { %2727 = vmatprep.subr.mxu0 %v3118_v0  ;;  %2758 = vmatprep.subr.mxu1 %v3118_v0 }
 0x59a   :  { %2728 = vmatpush3.msra.mxu0 %v3808_v3  ;;  %2759 = vmatpush3.msra.mxu1 %v3811_v4  ;;  %v1615_v3 = vld [vmem:[#allocation11 + $0x68] sm:$0xff]  ;;  %v1614_v4 = vld [vmem:[#allocation11 + $0x60] sm:$0xff] }
 0x59b   :  { %2729 = vmatprep.subr.mxu0 %v3118_v0  ;;  %2760 = vmatprep.subr.mxu1 %v3118_v0 }
 0x59c   :  { %2730 = vmatpush3.msra.mxu0 %v3816_v5  ;;  %2761 = vmatpush3.msra.mxu1 %v3819_v6  ;;  %v1613_v5 = vld [vmem:[#allocation11 + $0x58] sm:$0xff]  ;;  %v1612_v6 = vld [vmem:[#allocation11 + $0x50] sm:$0xff] }
 0x59d   :  { %2731 = vmatprep.subr.mxu0 %v3118_v0  ;;  %2762 = vmatprep.subr.mxu1 %v3118_v0 }
 0x59e   :  { %2732 = vmatpush3.msra.mxu0 %v3824_v7  ;;  %2763 = vmatpush3.msra.mxu1 %v3827_v8  ;;  %v1631_v7 = vld [vmem:[#allocation13 + $0x68] sm:$0xff] }
 0x59f   :  { %2733 = vmatprep.subr.mxu0 %v3118_v0  ;;  %2764 = vmatprep.subr.mxu1 %v3118_v0  ;;  %v1611_v8 = vld [vmem:[#allocation11 + $0x48] sm:$0xff] }
 0x5a0   :  { %2734 = vmatpush3.msra.mxu0 %v2925_v17  ;;  %2765 = vmatpush3.msra.mxu1 %v3833_v10  ;;  %v1630_v10 = vld [vmem:[#allocation13 + $0x60] sm:$0xff]  ;;  %v1621_v17 = vld [vmem:[#allocation13 + $0x18] sm:$0xff] }
 0x5a1   :  { %2735 = vmatprep.subr.mxu0 %v3118_v0  ;;  %2766 = vmatprep.subr.mxu1 %v3118_v0 }
 0x5a2   :  { %2736 = vmatpush3.msra.mxu0 %v2926_v18  ;;  %2767 = vmatpush3.msra.mxu1 %v3839_v11  ;;  %v1610_v11 = vld [vmem:[#allocation11 + $0x40] sm:$0xff]  ;;  %v1620_v18 = vld [vmem:[#allocation13 + $0x10] sm:$0xff] }
 0x5a3   :  { %2737 = vmatprep.subr.mxu0 %v3118_v0  ;;  %2768 = vmatprep.subr.mxu1 %v3118_v0 }
 0x5a4   :  { %2738 = vmatpush3.msra.mxu0 %v2927_v20  ;;  %2769 = vmatpush3.msra.mxu1 %v3845_v48  ;;  %v1629_v48 = vld [vmem:[#allocation13 + $0x58] sm:$0xff]  ;;  %v1619_v20 = vld [vmem:[#allocation13 + $0x8] sm:$0xff] }
 0x5a5   :  { %2739 = vmatprep.subr.mxu0 %v3118_v0  ;;  %2770 = vmatprep.subr.mxu1 %v3118_v0 }
 0x5a6   :  { %2740 = vmatpush3.msra.mxu0 %v2928_v21  ;;  %2771 = vmatpush3.msra.mxu1 %v3851_v50  ;;  %v1609_v50 = vld [vmem:[#allocation11 + $0x38] sm:$0xff]  ;;  %v1618_v21 = vld [vmem:[#allocation13] sm:$0xff] }
 0x5a7   :  { %2741 = vmatprep.subr.mxu0 %v3118_v0  ;;  %2772 = vmatprep.subr.mxu1 %v3118_v0 }
 0x5a8   :  { %2742 = vmatpush3.msra.mxu0 %v2929_v22  ;;  %2773 = vmatpush3.msra.mxu1 %v3857_v52  ;;  %v1628_v52 = vld [vmem:[#allocation13 + $0x50] sm:$0xff] }
 0x5a9   :  { %2743 = vmatprep.subr.mxu0 %v3118_v0  ;;  %2774 = vmatprep.subr.mxu1 %v3118_v0 }
 0x5aa   :  { %2744 = vmatpush3.msra.mxu0 %v2930_v23  ;;  %2775 = vmatpush3.msra.mxu1 %v3863_v54  ;;  %v1608_v54 = vld [vmem:[#allocation11 + $0x30] sm:$0xff] }
 0x5ab   :  { %2745 = vmatprep.subr.mxu0 %v3118_v0  ;;  %2776 = vmatprep.subr.mxu1 %v3118_v0 }
 0x5ac   :  { %2746 = vmatpush3.msra.mxu0 %v2931_v24  ;;  %2777 = vmatpush3.msra.mxu1 %v2932_v25 }
 0x5ad   :  { %2747 = vmatprep.subr.mxu0 %v3118_v0  ;;  %2778 = vmatprep.subr.mxu1 %v3118_v0 }
 0x5ae   :  { %2748 = vmatpush3.msra.mxu0 %v2933_v26  ;;  %2779 = vmatpush3.msra.mxu1 %v2934_v27 }
 0x5af   :  { %2749 = vmatprep.subr.mxu0 %v3118_v0  ;;  %2780 = vmatprep.subr.mxu1 %v3118_v0 }
 0x5b0   :  { %2750 = vmatpush3.msra.mxu0 %v2935_v28  ;;  %2781 = vmatpush3.msra.mxu1 %v2936_v29 }
 0x5b1   :  { %2782 = vmatprep.subr.mxu1 %v3118_v0  ;;  %2786 = vmatprep.mubr.msk.f32.mxu1 %vm3119_vm0, %v3118_v0 }
 0x5b2   :  { %2783 = vmatpush3.msra.mxu1 %v2937_v32  ;;  %2789 = vmatprep.subr.mxu0 %v3118_v0 }
 0x5b3   :  { %2784 = vmatprep.subr.mxu1 %v3118_v0 }
 0x5b4   :  { %2785 = vmatpush3.msra.mxu1 %v2938_v34 }
 0x5b5   :  { %2824 = vmatprep.subr.mxu1 %v3118_v0 }
 0x651   :  { %v1341_v35 = vpop.f32.mrf.mxu0 }
 0x652   :  { %v1346_v36 = vrot.slane %v1341_v35, 2 }
 0x653   :  { %v2683_v37 = vpop.f32.mrf.mxu0 }
 0x654   :  { %v1348_v38 = vadd.f32 %v1346_v36, %v3461_v9 }
 0x655   :  { %v1419_v39 = vpop.f32.mrf.mxu1 }
 0x656   :  { %2895 = vtanh.f32 %v1348_v38  ;;  %v1424_v40 = vrot.slane %v1419_v39, 7 }
 0x657   :  { %v2718_v41 = vpop.f32.mrf.mxu1 }
 0x658   :  { %v1426_v42 = vadd.f32 %v1424_v40, %v3463_v12  ;;  %v1782_v41 = vlaneseq }
 0x65a   :  { %2897 = vtanh.f32 %v1426_v42  ;;  %v1783_v42 = vand.u32 127, %v1782_v41 }
 0x65c   :  { %vm1784_vm8 = vcmp.lt.s32.totalorder %v1783_v42, 8 }
 0x663   :  { %v2896_v43 = vpop.eup %2895 }
 0x664   :  { %v1429_v44 = vrot.slane %v2896_v43, 6  ;;  %v3953_v47 = vsel %vm1591_vm6, %v3890_v2, %v2896_v43  ;;  %v1622_v2 = vld [vmem:[#allocation13 + $0x20] sm:$0xff] }
 0x666   :  { %2752 = vmatmul.mubr.f32.vlgmr.msra.gmra.mxu0 %v1429_v44 }
 0x667   :  { %v3955_v51 = vpop.eup %2897  ;;  %2790 = vmatpush3.msra.mxu0 %v1633_v46  ;;  %2821 = vmatprep.mubr.msk.f32.mxu0 %vm3119_vm0, %v3118_v0 }
 0x668   :  { %v1507_v53 = vrot.slane %v3955_v51, 1  ;;  %2791 = vmatprep.subr.mxu0 %v3118_v0 }
 0x669   :  { %2792 = vmatpush3.msra.mxu0 %v1632_v49 }
 0x66a   :  { %2787 = vmatmul.mubr.f32.vlgmr.msra.gmra.mxu1 %v1507_v53  ;;  %2793 = vmatprep.subr.mxu0 %v3118_v0 }
 0x66b   :  { %2825 = vmatpush3.msra.mxu1 %v1617_v55  ;;  %2856 = vmatprep.mubr.msk.f32.mxu1 %vm3119_vm0, %v3118_v0 }
 0x66c   :  { %2826 = vmatprep.subr.mxu1 %v3118_v0  ;;  %2794 = vmatpush3.msra.mxu0 %v1631_v7 }
 0x66d   :  { %2827 = vmatpush3.msra.mxu1 %v1616_v33  ;;  %2795 = vmatprep.subr.mxu0 %v3118_v0 }
 0x66e   :  { %2828 = vmatprep.subr.mxu1 %v3118_v0  ;;  %2796 = vmatpush3.msra.mxu0 %v1630_v10 }
 0x66f   :  { %2829 = vmatpush3.msra.mxu1 %v1615_v3  ;;  %2797 = vmatprep.subr.mxu0 %v3118_v0 }
 0x670   :  { %2830 = vmatprep.subr.mxu1 %v3118_v0  ;;  %2798 = vmatpush3.msra.mxu0 %v1629_v48 }
 0x671   :  { %2831 = vmatpush3.msra.mxu1 %v1614_v4  ;;  %2799 = vmatprep.subr.mxu0 %v3118_v0 }
 0x672   :  { %2832 = vmatprep.subr.mxu1 %v3118_v0  ;;  %2800 = vmatpush3.msra.mxu0 %v1628_v52 }
 0x673   :  { %2833 = vmatpush3.msra.mxu1 %v1613_v5  ;;  %2801 = vmatprep.subr.mxu0 %v3118_v0 }
 0x674   :  { %2834 = vmatprep.subr.mxu1 %v3118_v0  ;;  %2802 = vmatpush3.msra.mxu0 %v1627_v56 }
 0x675   :  { %2835 = vmatpush3.msra.mxu1 %v1612_v6  ;;  %2803 = vmatprep.subr.mxu0 %v3118_v0 }
 0x676   :  { %2836 = vmatprep.subr.mxu1 %v3118_v0  ;;  %2804 = vmatpush3.msra.mxu0 %v1626_v58 }
 0x677   :  { %2837 = vmatpush3.msra.mxu1 %v1611_v8  ;;  %2805 = vmatprep.subr.mxu0 %v3118_v0 }
 0x678   :  { %2838 = vmatprep.subr.mxu1 %v3118_v0  ;;  %2806 = vmatpush3.msra.mxu0 %v1625_v60 }
 0x679   :  { %2839 = vmatpush3.msra.mxu1 %v1610_v11  ;;  %2807 = vmatprep.subr.mxu0 %v3118_v0 }
 0x67a   :  { %2840 = vmatprep.subr.mxu1 %v3118_v0  ;;  %2808 = vmatpush3.msra.mxu0 %v1624_v62 }
 0x67b   :  { %2841 = vmatpush3.msra.mxu1 %v1609_v50  ;;  %2809 = vmatprep.subr.mxu0 %v3118_v0 }
 0x67c   :  { %2842 = vmatprep.subr.mxu1 %v3118_v0  ;;  %2810 = vmatpush3.msra.mxu0 %v1623_v63 }
 0x67d   :  { %2843 = vmatpush3.msra.mxu1 %v1608_v54  ;;  %2811 = vmatprep.subr.mxu0 %v3118_v0 }
 0x67e   :  { %2844 = vmatprep.subr.mxu1 %v3118_v0  ;;  %2812 = vmatpush3.msra.mxu0 %v1622_v2 }
 0x67f   :  { %2845 = vmatpush3.msra.mxu1 %v1607_v57  ;;  %2813 = vmatprep.subr.mxu0 %v3118_v0 }
 0x680   :  { %2846 = vmatprep.subr.mxu1 %v3118_v0  ;;  %2814 = vmatpush3.msra.mxu0 %v1621_v17 }
 0x681   :  { %2847 = vmatpush3.msra.mxu1 %v1606_v59  ;;  %2815 = vmatprep.subr.mxu0 %v3118_v0 }
 0x682   :  { %2848 = vmatprep.subr.mxu1 %v3118_v0  ;;  %2816 = vmatpush3.msra.mxu0 %v1620_v18 }
 0x683   :  { %2849 = vmatpush3.msra.mxu1 %v1605_v61  ;;  %2817 = vmatprep.subr.mxu0 %v3118_v0 }
 0x684   :  { %2850 = vmatprep.subr.mxu1 %v3118_v0  ;;  %2818 = vmatpush3.msra.mxu0 %v1619_v20 }
 0x685   :  { %2851 = vmatpush3.msra.mxu1 %v1604_v1  ;;  %2819 = vmatprep.subr.mxu0 %v3118_v0 }
 0x686   :  { %2852 = vmatprep.subr.mxu1 %v3118_v0  ;;  %2820 = vmatpush3.msra.mxu0 %v1618_v21 }
 0x687   :  { %2853 = vmatpush3.msra.mxu1 %v1603_v13 }
 0x688   :  { %2854 = vmatprep.subr.mxu1 %v3118_v0 }
 0x689   :  { %2855 = vmatpush3.msra.mxu1 %v1602_v15 }
 0x726   :  { %v1497_v22 = vpop.f32.mrf.mxu0 }
 0x727   :  { %v1502_v23 = vrot.slane %v1497_v22, 1 }
 0x728   :  { %v2753_v24 = vpop.f32.mrf.mxu0 }
 0x729   :  { %v1504_v25 = vadd.f32 %v1502_v23, %v3461_v9 }
 0x72a   :  { %v1575_v26 = vpop.f32.mrf.mxu1 }
 0x72b   :  { %2899 = vtanh.f32 %v1504_v25  ;;  %v1579_v27 = vadd.f32 %v1575_v26, %v3463_v12 }
 0x72c   :  { %v2788_v28 = vpop.f32.mrf.mxu1 }
 0x72d   :  { %2901 = vtanh.f32 %v1579_v27 }
 0x738   :  { %v2900_v29 = vpop.eup %2899 }
 0x739   :  { %v1594_v32 = vsel %vm1593_vm7, %v3953_v47, %v2900_v29 }
 0x73a   :  { %v2902_v34 = vpop.eup %2901  ;;  %2857 = vmatmul.mubr.f32.vlgmr.msra.gmra.mxu1 %v1594_v32 }
 0x73b   :  { %v1595_v0 = vsel %vm1581_vm1, %v2902_v34, %v3955_v51 }
 0x73c   :  { %v1596_v35 = vsel %vm1583_vm2, %v1595_v0, %v3892_v14 }
 0x73d   :  { %v1597_v9 = vsel %vm1585_vm3, %v1596_v35, %v3779_v45  ;;  %v1818_v45 = vld [vmem:[%s4023_s9] ss:$0 sm:$0xff]  ;;  %s3079_s9 = scalar_lea.vmem %s1805_s27, 128 }
 0x73e   :  { %v1598_v12 = vsel %vm1587_vm4, %v1597_v9, %v3702_v30  ;;  %p3080_p7 = scmp.ne.s32.totalorder %s1805_s27, %s3079_s9  ;;  %p3085_p9 = scmp.lt.s32.totalorder %s3079_s9, %s3079_s9 }
 0x73f   :  { %v1599_v36 = vsel %vm1589_vm5, %v1598_v12, %v3625_v16 }
 0x740   :  { %v1600_v37 = vsel %vm1591_vm6, %v1599_v36, %v3546_v31  ;;  %p3086_p10 = por %p3085_p9, %p3084_p8 }
 0x741   :  { %v1601_v38 = vsel %vm1593_vm7, %v1600_v37, %v3470_v19 }
 0x742   :  { %2822 = vmatmul.mubr.f32.vlgmr.msra.gmra.mxu0 %v1601_v38  ;;  %p3087_p11 = pnand %p3086_p10, %p3080_p7 }
 0x7fa   :  { %v1770_v39 = vpop.f32.mrf.mxu1 }
 0x7fc   :  { %v2858_v40 = vpop.f32.mrf.mxu1 }
 0x802   :  { %v1700_v14 = vpop.f32.mrf.mxu0 }
 0x803   :  { %v1771_v43 = vadd.f32 %v1770_v39, %v1700_v14 }
 0x804   :  { %v2823_v30 = vpop.f32.mrf.mxu0 }
 0x805   :  { %v1781_v44 = vadd.f32 %v1818_v45, %v1771_v43 }
 0x807   :  { %v1785_v16 = vsel %vm1784_vm8, %v1781_v44, -1e+30 }
 0x808   :  { %1786 = vmax.xlane.f32.xlu0 %v1785_v16 }
 0x891   :  { %v1787_v46 = vpop.xlane.xlu0 %1786 }
 0x892   :  { %v1788_v31 = vsub.f32 %v1785_v16, %v1787_v46 }
 0x894   :  { %v1789_v47 = vmul.f32 1.442695, %v1788_v31 }
 0x896   :  { %2903 = vpow2.f32 %v1789_v47 }
 0x8a3   :  { %v2904_v19 = vpop.eup %2903 }
 0x8a4   :  { %v1791_v49 = vsel %vm1784_vm8, %v2904_v19, 0.0 }
 0x8a5   :  { %1792 = vadd.xlane.f32.xlu0 %v1791_v49 }
 0x92e   :  { %v1793_v51 = vpop.xlane.xlu0 %1792 }
 0x92f   :  { %2905 = vlog2.f32 %v1793_v51 }
 0x93c   :  { %v2906_v53 = vpop.eup %2905 }
 0x93d   :  { %v1795_v55 = vmul.f32 0.6931472, %v2906_v53 }
 0x93f   :  { %v1796_v33 = vsub.f32 %v1788_v31, %v1795_v55 }
 0x941   :  { %1797 = vst [vmem:[#allocation14] sm:$0xff] %v1796_v33 }
 0x942   :  { %3090 = shalt.err (!%p3087_p11)
}
 0x943   :  { %1807 = dma.vmem_to_hbm [thread:$0]  %s1805_s27, 128, %s4024_s10, [#allocation4]  }
 0x944   :  { %3107 = dma.done.wait [#allocation4], 128  }
 0x945   :  { %3108 = vsyncadd [#allocation4], 4294967168 }
 0x946   :  { %1811 = vsyncpa [#allocation3], 1 }
 0x947   :  { %1812 = vsyncpa [#allocation6], 1 }
 0x948   :  { %1813 = vsyncpa [#allocation9], 1 }
 0x949   :  { %1814 = vsyncpa [#allocation12], 1 }
 0x94a   :  { %1815 = vsyncpa [#allocation4], 1 }

</bundles_post_ra>
